<compile_context>
chip_gen: v7x
topology: tpu7x:2x2x1
jax: 0.10.0
libtpu: 0.0.40
codegen_flags: <defaults>
</compile_context>

<pallas_src>
import functools
import math

import jax
import jax.numpy as jnp
from jax.experimental import pallas as pl
from jax.experimental.pallas import tpu as pltpu


def _sdpa_kernel(q_ref, k_ref, v_ref, mask_ref, ctx_ref, attn_ref, *, scale):
    # Each ref holds one (batch*head, q-tile) slice; leading block dim is 1.
    q = q_ref[0]        # (TQ, Dk)  native dtype
    k = k_ref[0]        # (Lk, Dk)  native dtype
    v = v_ref[0]        # (Lk, Dv)  native dtype
    m = mask_ref[0]     # (TQ, Lk)  int8, nonzero == masked

    # Fold the 1/sqrt(d_k) scale into Q (cheaper than scaling (TQ, Lk) scores).
    qs = q * jnp.asarray(scale, q.dtype)

    # scores = Q @ K^T : contract last dims of both operands -> no K transpose.
    scores = jax.lax.dot_general(
        qs, k,
        dimension_numbers=(((1,), (1,)), ((), ())),
        preferred_element_type=jnp.float32,
    )

    # masked_fill_(attn_mask, -1e9)
    scores = jnp.where(m != 0, jnp.float32(-1.0e9), scores)

    # Numerically stable softmax over the key axis (kept in f32).
    s_max = jnp.max(scores, axis=-1, keepdims=True)
    p = jnp.exp(scores - s_max)
    denom = jnp.sum(p, axis=-1, keepdims=True)
    attn = p * pl.reciprocal(denom, approx=True)

    # context = attn @ V  (MXU, f32 accumulate)
    ctx = jax.lax.dot_general(
        attn.astype(v.dtype), v,
        dimension_numbers=(((1,), (0,)), ((), ())),
        preferred_element_type=jnp.float32,
    )

    attn_ref[0] = attn.astype(attn_ref.dtype)
    ctx_ref[0] = ctx.astype(ctx_ref.dtype)


def _choose_block_q(Lq, target):
    """Largest q-tile <= target that divides Lq and is sublane-aligned (8)."""
    if Lq <= target:
        return Lq
    for t in range(target, 7, -1):
        if Lq % t == 0 and t % 8 == 0:
            return t
    return Lq  # fallback: single q tile


def scaled_dot_product_attention(Q, K, V, attn_mask, *, block_q=256):
    """Q:[B,H,Lq,Dk] K:[B,H,Lk,Dk] V:[B,H,Lk,Dv] attn_mask:[B,H,Lq,Lk] (bool/int).

    Returns (context:[B,H,Lq,Dv], attn:[B,H,Lq,Lk]) in Q's dtype.
    """
    B, H, Lq, Dk = Q.shape
    Lk = K.shape[2]
    Dv = V.shape[3]
    BH = B * H

    # Keep native dtype (no f32 up-cast): halves HBM/VMEM traffic for bf16 inputs.
    q = Q.reshape(BH, Lq, Dk)
    k = K.reshape(BH, Lk, Dk)
    v = V.reshape(BH, Lk, Dv)
    # int8 mask: 4x fewer HBM bytes than int32 for the (BH, Lq, Lk) stream.
    m = attn_mask.reshape(BH, Lq, Lk).astype(jnp.int8)

    scale = 1.0 / math.sqrt(Dk)  # np.sqrt(d_k) in the reference
    out_dtype = Q.dtype

    TQ = _choose_block_q(Lq, block_q)
    n_q = Lq // TQ

    kernel = functools.partial(_sdpa_kernel, scale=scale)

    bytes_in = (q.size * q.dtype.itemsize + k.size * k.dtype.itemsize
                + v.size * v.dtype.itemsize + m.size)
    bytes_out = (BH * Lq * Dv + BH * Lq * Lk) * jnp.dtype(out_dtype).itemsize
    cost = pl.CostEstimate(
        flops=2 * BH * Lq * Lk * (Dk + Dv),
        transcendentals=BH * Lq * Lk,
        bytes_accessed=bytes_in + bytes_out,
    )

    ctx, attn = pl.pallas_call(
        kernel,
        out_shape=(
            jax.ShapeDtypeStruct((BH, Lq, Dv), out_dtype),
            jax.ShapeDtypeStruct((BH, Lq, Lk), out_dtype),
        ),
        grid=(BH, n_q),
        in_specs=[
            pl.BlockSpec((1, TQ, Dk), lambda i, j: (i, j, 0)),
            # K/V: same block for every q-tile -> stays VMEM-resident across j.
            pl.BlockSpec((1, Lk, Dk), lambda i, j: (i, 0, 0)),
            pl.BlockSpec((1, Lk, Dv), lambda i, j: (i, 0, 0)),
            pl.BlockSpec((1, TQ, Lk), lambda i, j: (i, j, 0)),
        ],
        out_specs=(
            pl.BlockSpec((1, TQ, Dv), lambda i, j: (i, j, 0)),
            pl.BlockSpec((1, TQ, Lk), lambda i, j: (i, j, 0)),
        ),
        compiler_params=pltpu.CompilerParams(
            dimension_semantics=("parallel", "parallel"),
            vmem_limit_bytes=48 * 1024 * 1024,  # headroom under v7x's 64 MiB
        ),
        cost_estimate=cost,
    )(q, k, v, m)

    return ctx.reshape(B, H, Lq, Dv), attn.reshape(B, H, Lq, Lk)


def _reference(Q, K, V, attn_mask):
    Dk = Q.shape[-1]
    scores = jnp.einsum("bhqd,bhkd->bhqk", Q, K) / math.sqrt(Dk)
    scores = jnp.where(attn_mask, -1.0e9, scores)
    attn = jax.nn.softmax(scores, axis=-1)
    ctx = jnp.einsum("bhqk,bhkd->bhqd", attn, V)
    return ctx, attn


if __name__ == "__main__":
    key = jax.random.PRNGKey(0)
    kq, kk, kv, km = jax.random.split(key, 4)

    # Small but lane/sublane-friendly shapes; block_q=128 exercises q-tiling
    # (two q-tiles per head) with K/V held VMEM-resident across them.
    B, H, Lq, Lk, Dk, Dv = 2, 2, 256, 256, 64, 64

    Q = jax.random.normal(kq, (B, H, Lq, Dk), dtype=jnp.float32)
    K = jax.random.normal(kk, (B, H, Lk, Dk), dtype=jnp.float32)
    V = jax.random.normal(kv, (B, H, Lk, Dv), dtype=jnp.float32)
    # boolean mask: True == masked out (as in torch masked_fill_)
    attn_mask = jax.random.uniform(km, (B, H, Lq, Lk)) > 0.7

    ctx, attn = scaled_dot_product_attention(Q, K, V, attn_mask, block_q=128)
    jax.block_until_ready((ctx, attn))

    ctx_ref, attn_ref = _reference(Q, K, V, attn_mask)
    # Tolerances account for the EUP approximate reciprocal in the softmax.
    assert jnp.allclose(ctx, ctx_ref, atol=1e-2, rtol=1e-2), "context mismatch"
    assert jnp.allclose(attn, attn_ref, atol=1e-2, rtol=1e-2), "attn mismatch"

    print("KERNEL_OK")
</pallas_src>

<mosaic_0001>
module attributes {stable_mosaic.version = 11 : i64} {
  func.func @_sdpa_kernel(%arg0: i32, %arg1: i32, %arg2: memref<1x128x64xf32, #tpu.memory_space<vmem>>, %arg3: memref<1x256x64xf32, #tpu.memory_space<vmem>>, %arg4: memref<1x256x64xf32, #tpu.memory_space<vmem>>, %arg5: memref<1x128x256xi8, #tpu.memory_space<vmem>>, %arg6: memref<1x128x64xf32, #tpu.memory_space<vmem>>, %arg7: memref<1x128x256xf32, #tpu.memory_space<vmem>>) attributes {dimension_semantics = [#tpu.dimension_semantics<parallel>, #tpu.dimension_semantics<parallel>], iteration_bounds = array<i64: 4, 2>, scalar_prefetch = 0 : i64, scratch_operands = 0 : i64, tpu.core_type = #tpu.core_type<tc>, window_params = [{transform_indices = @transform_0, window_bounds = array<i64: 1, 128, 64>}, {transform_indices = @transform_1, window_bounds = array<i64: 1, 256, 64>}, {transform_indices = @transform_2, window_bounds = array<i64: 1, 256, 64>}, {transform_indices = @transform_3, window_bounds = array<i64: 1, 128, 256>}, {transform_indices = @transform_4, window_bounds = array<i64: 1, 128, 64>}, {transform_indices = @transform_5, window_bounds = array<i64: 1, 128, 256>}]} {
    %c0 = arith.constant 0 : index
    %c0_0 = arith.constant 0 : index
    %c0_1 = arith.constant 0 : index
    %0 = vector.load %arg2[%c0, %c0_0, %c0_1] : memref<1x128x64xf32, #tpu.memory_space<vmem>>, vector<1x128x64xf32>
    %1 = vector.shape_cast %0 : vector<1x128x64xf32> to vector<128x64xf32>
    %c0_2 = arith.constant 0 : index
    %c0_3 = arith.constant 0 : index
    %c0_4 = arith.constant 0 : index
    %2 = vector.load %arg3[%c0_2, %c0_3, %c0_4] : memref<1x256x64xf32, #tpu.memory_space<vmem>>, vector<1x256x64xf32>
    %3 = vector.shape_cast %2 : vector<1x256x64xf32> to vector<256x64xf32>
    %c0_5 = arith.constant 0 : index
    %c0_6 = arith.constant 0 : index
    %c0_7 = arith.constant 0 : index
    %4 = vector.load %arg4[%c0_5, %c0_6, %c0_7] : memref<1x256x64xf32, #tpu.memory_space<vmem>>, vector<1x256x64xf32>
    %5 = vector.shape_cast %4 : vector<1x256x64xf32> to vector<256x64xf32>
    %c0_8 = arith.constant 0 : index
    %c0_9 = arith.constant 0 : index
    %c0_10 = arith.constant 0 : index
    %6 = vector.load %arg5[%c0_8, %c0_9, %c0_10] : memref<1x128x256xi8, #tpu.memory_space<vmem>>, vector<1x128x256xi8>
    %7 = vector.shape_cast %6 : vector<1x128x256xi8> to vector<128x256xi8>
    %cst = arith.constant 1.250000e-01 : f32
    %8 = vector.broadcast %cst : f32 to vector<128x64xf32>
    %9 = arith.mulf %1, %8 : vector<128x64xf32>
    %cst_11 = arith.constant dense<0.000000e+00> : vector<128x256xf32>
    %10 = tpu.matmul %9, %3, %cst_11 {dimension_numbers = #tpu.dot_dimension_numbers<[1], [1], [0], [0], [0, 0, 1, 0], [], []>} : vector<128x64xf32>, vector<256x64xf32>, vector<128x256xf32> -> vector<128x256xf32>
    %c0_i8 = arith.constant 0 : i8
    %11 = vector.broadcast %c0_i8 : i8 to vector<128x256xi8>
    %12 = arith.cmpi ne, %7, %11 : vector<128x256xi8>
    %cst_12 = arith.constant -1.000000e+09 : f32
    %13 = vector.broadcast %cst_12 : f32 to vector<128x256xf32>
    %14 = arith.select %12, %13, %10 : vector<128x256xi1>, vector<128x256xf32>
    %cst_13 = arith.constant dense<0xFF800000> : vector<128xf32>
    %15 = vector.multi_reduction <maximumf>, %14, %cst_13 [1] : vector<128x256xf32> to vector<128xf32>
    %16 = vector.shape_cast %15 : vector<128xf32> to vector<128x1xf32>
    %17 = vector.broadcast %16 : vector<128x1xf32> to vector<128x256xf32>
    %18 = arith.subf %14, %17 : vector<128x256xf32>
    %19 = math.exp %18 : vector<128x256xf32>
    %cst_14 = arith.constant dense<0.000000e+00> : vector<128xf32>
    %20 = vector.multi_reduction <add>, %19, %cst_14 [1] : vector<128x256xf32> to vector<128xf32>
    %21 = vector.shape_cast %20 : vector<128xf32> to vector<128x1xf32>
    %22 = tpu.reciprocal %21 {approx = true} : vector<128x1xf32> -> vector<128x1xf32>
    %23 = vector.broadcast %22 : vector<128x1xf32> to vector<128x256xf32>
    %24 = arith.mulf %19, %23 : vector<128x256xf32>
    %cst_15 = arith.constant dense<0.000000e+00> : vector<128x64xf32>
    %25 = tpu.matmul %24, %5, %cst_15 {dimension_numbers = #tpu.dot_dimension_numbers<[1], [0], [0], [1], [0, 0, 1, 1], [], []>} : vector<128x256xf32>, vector<256x64xf32>, vector<128x64xf32> -> vector<128x64xf32>
    %c0_16 = arith.constant 0 : index
    %c0_17 = arith.constant 0 : index
    %c0_18 = arith.constant 0 : index
    %26 = vector.load %arg7[%c0_16, %c0_17, %c0_18] : memref<1x128x256xf32, #tpu.memory_space<vmem>>, vector<1x128x256xf32>
    %27 = vector.shape_cast %26 : vector<1x128x256xf32> to vector<128x256xf32>
    %28 = vector.shape_cast %24 : vector<128x256xf32> to vector<1x128x256xf32>
    tpu.vector_store %arg7[%c0_16, %c0_17, %c0_18], %28 {strides = array<i32>} : memref<1x128x256xf32, #tpu.memory_space<vmem>>, vector<1x128x256xf32>,
    %c0_19 = arith.constant 0 : index
    %c0_20 = arith.constant 0 : index
    %c0_21 = arith.constant 0 : index
    %29 = vector.load %arg6[%c0_19, %c0_20, %c0_21] : memref<1x128x64xf32, #tpu.memory_space<vmem>>, vector<1x128x64xf32>
    %30 = vector.shape_cast %29 : vector<1x128x64xf32> to vector<128x64xf32>
    %31 = vector.shape_cast %25 : vector<128x64xf32> to vector<1x128x64xf32>
    tpu.vector_store %arg6[%c0_19, %c0_20, %c0_21], %31 {strides = array<i32>} : memref<1x128x64xf32, #tpu.memory_space<vmem>>, vector<1x128x64xf32>,
    return
  }
  func.func @transform_0(%arg0: i32, %arg1: i32) -> (i32, i32, i32) {
    %c0_i32 = arith.constant 0 : i32
    %c0_i32_0 = arith.constant 0 : i32
    return %arg0, %arg1, %c0_i32 : i32, i32, i32
  }
  func.func @transform_1(%arg0: i32, %arg1: i32) -> (i32, i32, i32) {
    %c0_i32 = arith.constant 0 : i32
    %c0_i32_0 = arith.constant 0 : i32
    %c0_i32_1 = arith.constant 0 : i32
    return %arg0, %c0_i32, %c0_i32_0 : i32, i32, i32
  }
  func.func @transform_2(%arg0: i32, %arg1: i32) -> (i32, i32, i32) {
    %c0_i32 = arith.constant 0 : i32
    %c0_i32_0 = arith.constant 0 : i32
    %c0_i32_1 = arith.constant 0 : i32
    return %arg0, %c0_i32, %c0_i32_0 : i32, i32, i32
  }
  func.func @transform_3(%arg0: i32, %arg1: i32) -> (i32, i32, i32) {
    %c0_i32 = arith.constant 0 : i32
    %c0_i32_0 = arith.constant 0 : i32
    return %arg0, %arg1, %c0_i32 : i32, i32, i32
  }
  func.func @transform_4(%arg0: i32, %arg1: i32) -> (i32, i32, i32) {
    %c0_i32 = arith.constant 0 : i32
    %c0_i32_0 = arith.constant 0 : i32
    return %arg0, %arg1, %c0_i32 : i32, i32, i32
  }
  func.func @transform_5(%arg0: i32, %arg1: i32) -> (i32, i32, i32) {
    %c0_i32 = arith.constant 0 : i32
    %c0_i32_0 = arith.constant 0 : i32
    return %arg0, %arg1, %c0_i32 : i32, i32, i32
  }
}

</mosaic_0001>

<bundles_post_ra>
// kernel: tpu_custom_call.1
= control target key start
LH: loop header
LB: loop body
LE: loop exit
PB: predicated region body
PF: predicated region fallthrough
CT: control target
= control target key end

     0   :  { %s2971_s0 = inlined_call_operand.vmem [shape: f32[4,256,64], index: 0, kind: input, shape index: {}]   ;;  %s2972_s1 = inlined_call_operand.vmem [shape: f32[4,256,64], index: 1, kind: input, shape index: {}]   ;;  %s2973_s2 = inlined_call_operand.vmem [shape: f32[4,256,64], index: 2, kind: input, shape index: {}]   ;;  %s2974_s3 = inlined_call_operand.vmem [shape: s8[4,256,256], index: 3, kind: input, shape index: {}]   ;;  %s2975_s4 = inlined_call_operand.vmem [shape: f32[4,256,64], index: 4, kind: output, shape index: {0}]   ;;  %s2976_s5 = inlined_call_operand.hbm [shape: f32[4,256,256], index: 5, kind: output, shape index: {1}]  }
   0x1   :  { %2978 = sst [smem:[#allocation5_spill]] %s2971_s0 }
   0x2   :  { %11 = vsyncpa [#allocation3], 0 }
   0x3   :  { %13 = vsyncpa [#allocation3 + $0x1], 0  ;;  %s2206_s18 = smov 0   ;;  %s2208_s19 = smov 0  }
   0x4   :  { %s2210_s20 = smov 0   ;;  %s2212_s21 = smov 0  }
   0x5   :  { %s2214_s22 = smov 0   ;;  %s2216_s23 = smov 0  }
   0x6   :  { %s2218_s24 = smov 0   ;;  %s2220_s25 = smov 0  }
   0x7 LB: > { %s1604_s26 = sadd.s32 4294967295, %s2170_s25   ;;  %s1605_s27 = sadd.s32 4294967294, %s2170_s25   ;;  %s2170_s25 = sphi %s2220_s25, %s19_s25   ;;  %s2166_s24 = sphi %s2218_s24, %s3009_s24   ;;  %s2162_s23 = sphi %s2216_s23, %s3008_s23   ;;  %s2158_s22 = sphi %s2214_s22, %s3007_s22   ;;  %s2154_s21 = sphi %s2212_s21, %s3006_s21   ;;  %s2150_s20 = sphi %s2210_s20, %s3005_s20   ;;  %s2146_s19 = sphi %s2208_s19, %s3004_s19   ;;  %s2142_s18 = sphi %s2206_s18, %s3003_s18  }
   0x8   : > { %s28_s28 = sadd.s32 1, %s2162_s23  ;;  %s31_s29 = sadd.s32 1, %s2166_s24 }
   0x9   : > { %p29_p0 = scmp.ge.s32.totalorder %s28_s28, 2  ;;  %p186_p1 = scmp.ne.s32.totalorder %s2150_s20, %s2146_s19 }
   0xa   : > { %p187_p2 = scmp.eq.s32.totalorder %s1604_s26, 7  ;;  %p192_p5 = scmp.ne.s32.totalorder %s2146_s19, %s2142_s18 }
   0xb   : > { %s3011_s28 = smov (%p29_p0, %s28_s28), 0  ;;  %s3013_s29 = smov (!%p29_p0, %s31_s29), %s2166_s24 }
   0xc   : > { %s172_s30 = ssub.s32 %s2162_s23, %s3011_s28  ;;  %p2257_p3 = por %p187_p2, %p186_p1 }
   0xd   : > { %p33_p4 = scmp.ge.s32.totalorder %s3013_s29, 4  ;;  %p193_p6 = scmp.eq.s32.totalorder %s1605_s27, 7 }
   0xe   : > { %p1608_p7 = scmp.ge.s32.totalorder %s2170_s25, 1  ;;  %p254_p9 = scmp.lt.s32.totalorder %s2170_s25, 9 }
   0xf   : > { %s3015_s29 = smov (%p33_p4, %s3013_s29), 0  ;;  %p2266_p8 = por %p193_p6, %p192_p5 }
  0x10   : > { %s171_s8 = ssub.s32 %s2166_s24, %s3015_s29  ;;  %s176_s9 = sadd.s32 1, %s2150_s20 }
  0x11   : > { %s173_s10 = sor.u32 %s172_s30, %s171_s8  ;;  %p255_p10 = pnand %p1608_p7, %p254_p9 }
  0x12   : > { %p174_p11 = scmp.eq.s32.totalorder %s173_s10, 0  ;;  %p316_p12 = scmp.lt.s32.totalorder (!%p255_p10), %s2158_s22, 3  ;;  %vm463_vm0 = vcmask (!%p255_p10), 523264  }
  0x13   : > { %258 = sbr.rel (%p255_p10) target bundleno = 905 (0x389), region = 36  ;;  %s1610_s12 = sshll.u32 (!%p255_p10), %s2154_s21, 4  ;;  %vm2293_vm1 = vmpackc.low (!%p255_p10), %vm463_vm0, %vm463_vm0 }
  0x14   : > { %s2275_s11 = scalar_select %p174_p11, %s2150_s20, %s176_s9  }
  0x15   : > { %p318_p13 = scmp.lt.s32.totalorder (!%p255_p10), %s1610_s12, 31  ;;  %s2983_s0 = sld [smem:[#allocation5_spill]] (!%p255_p10) }
  0x16   : > { %s1675_s8 = sshll.u32 (!%p255_p10), %s2158_s22, 6 }
  0x1a   : > { %s2280_s13 = scalar_select %p316_p12, %s2158_s22, 3 }
  0x1b   : > { %s3017_s12 = smov (!%p318_p13, %s1610_s12), 31 }
  0x1c   : > { %s1679_s14 = sshll.u32 %s2280_s13, 8  ;;  %s1611_s15 = sshll.u32 %s2280_s13, 5 }
  0x1d   : > { %s2289_s26 = scalar_lea.vmem %s2972_s1, %s1679_s14  ;;  %s2303_s27 = sadd.s32 %s1611_s15, %s3017_s12 }
  0x1e   : > { %v391_v1 = vld [vmem:[%s2289_s26 + $0x80] sm:$0xff]  ;;  %v392_v2 = vld [vmem:[%s2289_s26 + $0x88] sm:$0xff]  ;;  %v393_v6 = vld [vmem:[%s2289_s26 + $0x90] sm:$0xff]  ;;  %s2977_s30 = sshll.u32 %s2303_s27, 3  ;;  %s1617_s12 = sshll.u32 %s2154_s21, 2 }
  0x1f   : > { %v375_v3 = vld [vmem:[%s2289_s26] sm:$0xff]  ;;  %v1826_v4 = vpack.c.bf16 %v392_v2, %v391_v1  ;;  %v376_v5 = vld [vmem:[%s2289_s26 + $0x8] sm:$0xff]  ;;  %v394_v7 = vld [vmem:[%s2289_s26 + $0x98] sm:$0xff]  ;;  %s2321_s10 = scalar_lea.vmem %s2983_s0, %s2977_s30  ;;  %p338_p0 = scmp.lt.s32.totalorder %s1617_s12, 7 }
  0x20   : > { %v1829_v8 = vpack.c.bf16 %v376_v5, %v375_v3  ;;  %v1832_v9 = vpack.c.bf16 %v394_v7, %v393_v6  ;;  %v377_v10 = vld [vmem:[%s2289_s26 + $0x10] sm:$0xff]  ;;  %v378_v11 = vld [vmem:[%s2289_s26 + $0x18] sm:$0xff]  ;;  %v395_v12 = vld [vmem:[%s2289_s26 + $0xa0] sm:$0xff]  ;;  %s1619_s16 = sshll.u32 %s2280_s13, 4  ;;  %s312_s13 = sand.u32 1, %s2146_s19  }
  0x21   : > { %1828 = vmatprep.subr.msk.bf16.mxu0 %vm2293_vm1, %v1826_v4  ;;  %v396_v13 = vld [vmem:[%s2289_s26 + $0xa8] sm:$0xff]  ;;  %v1835_v14 = vpack.c.bf16 %v378_v11, %v377_v10  ;;  %v359_v16 = vld [vmem:[%s2321_s10] sm:$0xff]  ;;  %v397_v20 = vld [vmem:[%s2289_s26 + $0xb0] sm:$0xff]  ;;  %s3019_s12 = smov (!%p338_p0, %s1617_s12), 7  ;;  %s2880_s30 = scalar_lea.sflag [#allocation3], %s312_s13 }
  0x22   : > { %1831 = vmatpush3.bf16.xpose.msk.msra.mxu0 %vm2293_vm1, %v1829_v8  ;;  %v1838_v15 = vpack.c.bf16 %v396_v13, %v395_v12  ;;  %v447_v17 = vmul.f32 0.125, %v359_v16  ;;  %v379_v18 = vld [vmem:[%s2289_s26 + $0x20] sm:$0xff]  ;;  %v380_v19 = vld [vmem:[%s2289_s26 + $0x28] sm:$0xff]  ;;  %v398_v21 = vld [vmem:[%s2289_s26 + $0xb8] sm:$0xff]  ;;  %s1618_s15 = sshll.u32 %s3019_s12, 1 }
  0x23   : > { %1834 = vmatprep.subr.msk.bf16.mxu0 %vm2293_vm1, %v1832_v9  ;;  %v1841_v22 = vpack.c.bf16 %v380_v19, %v379_v18  ;;  %v1844_v23 = vpack.c.bf16 %v398_v21, %v397_v20  ;;  %v381_v24 = vld [vmem:[%s2289_s26 + $0x30] sm:$0xff]  ;;  %v382_v25 = vld [vmem:[%s2289_s26 + $0x38] sm:$0xff]  ;;  %v399_v26 = vld [vmem:[%s2289_s26 + $0xc0] sm:$0xff]  ;;  %s342_s17 = sadd.s32 %s1619_s16, %s1618_s15  ;;  %v2172_v19 = vmov 0   ;;  %s2637_s16 = scalar_lea.vmem %s2973_s2, %s1679_s14 }
  0x24   : > { %1714 = vmatprep.mubr.msk.f32.mxu0 %vm463_vm0, %v447_v17  ;;  %v400_v27 = vld [vmem:[%s2289_s26 + $0xc8] sm:$0xff]  ;;  %v1847_v28 = vpack.c.bf16 %v382_v25, %v381_v24  ;;  %v383_v30 = vld [vmem:[%s2289_s26 + $0x40] sm:$0xff]  ;;  %v401_v32 = vld [vmem:[%s2289_s26 + $0xd0] sm:$0xff]  ;;  %s1609_s14 = sshll.u32 %s312_s13, 8 }
  0x25   : > { %v1850_v29 = vpack.c.bf16 %v400_v27, %v399_v26  ;;  %v384_v31 = vld [vmem:[%s2289_s26 + $0x48] sm:$0xff]  ;;  %v402_v33 = vld [vmem:[%s2289_s26 + $0xd8] sm:$0xff]  ;;  %v385_v36 = vld [vmem:[%s2289_s26 + $0x50] sm:$0xff] }
  0x26   : > { %v1853_v34 = vpack.c.bf16 %v384_v31, %v383_v30  ;;  %v1856_v35 = vpack.c.bf16 %v402_v33, %v401_v32  ;;  %v386_v37 = vld [vmem:[%s2289_s26 + $0x58] sm:$0xff]  ;;  %v403_v38 = vld [vmem:[%s2289_s26 + $0xe0] sm:$0xff]  ;;  %v404_v39 = vld [vmem:[%s2289_s26 + $0xe8] sm:$0xff] }
  0x27   : > { %v1859_v40 = vpack.c.bf16 %v386_v37, %v385_v36  ;;  %v1862_v41 = vpack.c.bf16 %v404_v39, %v403_v38  ;;  %v387_v42 = vld [vmem:[%s2289_s26 + $0x60] sm:$0xff]  ;;  %v388_v43 = vld [vmem:[%s2289_s26 + $0x68] sm:$0xff]  ;;  %v405_v44 = vld [vmem:[%s2289_s26 + $0xf0] sm:$0xff] }
  0x28   : > { %v406_v45 = vld [vmem:[%s2289_s26 + $0xf8] sm:$0xff]  ;;  %v1865_v46 = vpack.c.bf16 %v388_v43, %v387_v42  ;;  %v389_v48 = vld [vmem:[%s2289_s26 + $0x70] sm:$0xff]  ;;  %v360_v51 = vld [vmem:[%s2321_s10 + $0x8] sm:$0xff] }
  0x29   : > { %v1868_v47 = vpack.c.bf16 %v406_v45, %v405_v44  ;;  %v390_v49 = vld [vmem:[%s2289_s26 + $0x78] sm:$0xff]  ;;  %v448_v52 = vmul.f32 0.125, %v360_v51  ;;  %v361_v53 = vld [vmem:[%s2321_s10 + $0x10] sm:$0xff]  ;;  %v363_v57 = vld [vmem:[%s2321_s10 + $0x20] sm:$0xff]  ;;  %s1620_s26 = sshll.u32 %s342_s17, 3  ;;  %s2804_s17 = scalar_lea.vmem [#allocation2], %s1609_s14 }
  0x2a   : > { %1837 = vmatpush3.bf16.xpose.msk.msra.mxu0 %vm2293_vm1, %v1835_v14  ;;  %v1871_v50 = vpack.c.bf16 %v390_v49, %v389_v48  ;;  %v449_v54 = vmul.f32 0.125, %v361_v53  ;;  %v362_v55 = vld [vmem:[%s2321_s10 + $0x18] sm:$0xff]  ;;  %v451_v58 = vmul.f32 0.125, %v363_v57  ;;  %v364_v59 = vld [vmem:[%s2321_s10 + $0x28] sm:$0xff]  ;;  %v365_v61 = vld [vmem:[%s2321_s10 + $0x30] sm:$0xff]  ;;  %s1440_s12 = sshll.u32 %s2804_s17, 4  ;;  %s2876_s12 = int_to_ptr.vmem [resolvable:$true] %s1440_s12 }
  0x2b   : > { %1840 = vmatprep.subr.msk.bf16.mxu0 %vm2293_vm1, %v1838_v15  ;;  %v450_v56 = vmul.f32 0.125, %v362_v55  ;;  %v452_v60 = vmul.f32 0.125, %v364_v59  ;;  %v453_v62 = vmul.f32 0.125, %v365_v61  ;;  %v366_v63 = vld [vmem:[%s2321_s10 + $0x38] sm:$0xff]  ;;  %v367_v1 = vld [vmem:[%s2321_s10 + $0x40] sm:$0xff]  ;;  %v368_v3 = vld [vmem:[%s2321_s10 + $0x48] sm:$0xff] }
  0x2c   : > { %v454_v0 = vmul.f32 0.125, %v366_v63  ;;  %v455_v2 = vmul.f32 0.125, %v367_v1  ;;  %v456_v4 = vmul.f32 0.125, %v368_v3  ;;  %v369_v5 = vld [vmem:[%s2321_s10 + $0x50] sm:$0xff]  ;;  %v370_v7 = vld [vmem:[%s2321_s10 + $0x58] sm:$0xff]  ;;  %v371_v9 = vld [vmem:[%s2321_s10 + $0x60] sm:$0xff] }
  0x2d   : > { %v457_v6 = vmul.f32 0.125, %v369_v5  ;;  %v458_v8 = vmul.f32 0.125, %v370_v7  ;;  %v459_v10 = vmul.f32 0.125, %v371_v9  ;;  %v372_v11 = vld [vmem:[%s2321_s10 + $0x68] sm:$0xff]  ;;  %v373_v13 = vld [vmem:[%s2321_s10 + $0x70] sm:$0xff]  ;;  %v374_v15 = vld [vmem:[%s2321_s10 + $0x78] sm:$0xff]  ;;  %s2424_s10 = scalar_lea.vmem %s2974_s3, %s1620_s26 }
  0x2e   : > { %v460_v12 = vmul.f32 0.125, %v372_v11  ;;  %v461_v14 = vmul.f32 0.125, %v373_v13  ;;  %v462_v16 = vmul.f32 0.125, %v374_v15  ;;  %v440_v18 = vld [vmem:[%s2424_s10 + $0x8] sm:$0xff]  ;;  %v443_v55 = vld [vmem:[%s2424_s10 + $0x20] sm:$0xff]  ;;  %s1681_s26 = sshll.u32 %s2154_s21, 5 }
  0x2f   : > { %vm770_vm3 = vnez %v440_v18  ;;  %vm773_vm14 = vnez %v443_v55  ;;  %s1437_s9 = sadd.s32 %s1681_s26, %s1675_s8  ;;  %s2076_s0 = scalar_lea.vmem %s2876_s12, 4096 }
  0x30   : > { %v778_v21 = vsel %vm770_vm3, 16843009, %v2172_v19  ;;  %p2077_p1 = scmp.ne.s32.totalorder %s2876_s12, %s2076_s0  ;;  %s2173_s21 = smov [#allocation2]  }
  0x31   : > { %v788_v25 = vunpack.c.1.s8 %v778_v21  ;;  %v790_v31 = vunpack.c.2.s8 %v778_v21  ;;  %v792_v36 = vunpack.c.3.s8 %v778_v21  ;;  %s2080_s22 = sshll.u32 %s2173_s21, 4  ;;  %s2081_s22 = int_to_ptr.vmem [resolvable:$false] %s2080_s22 }
  0x32   : > { %1843 = vmatpush3.bf16.xpose.msk.msra.mxu0 %vm2293_vm1, %v1841_v22  ;;  %p2078_p2 = pnand %p2077_p1, %p2257_p3  ;;  %p2083_p5 = scmp.lt.s32.totalorder %s2876_s12, %s2081_s22 }
  0x33   : > { %1846 = vmatprep.subr.msk.bf16.mxu0 %vm2293_vm1, %v1844_v23  ;;  %v786_v23 = vunpack.c.0.s8 %v778_v21 }
  0x34   : > { %p2079_p4 = pneg %p2078_p2 }
  0x3a   : > { %1849 = vmatpush3.bf16.xpose.msk.msra.mxu0 %vm2293_vm1, %v1847_v28  ;;  %v441_v28 = vld [vmem:[%s2424_s10 + $0x10] sm:$0xff] }
  0x3b   : > { %1852 = vmatprep.subr.msk.bf16.mxu0 %vm2293_vm1, %v1850_v29  ;;  %v442_v29 = vld [vmem:[%s2424_s10 + $0x18] sm:$0xff]  ;;  %vm771_vm4 = vnez %v441_v28 }
  0x3c   : > { %vm772_vm5 = vnez %v442_v29  ;;  %v779_v37 = vsel %vm771_vm4, 16843009, %v2172_v19 }
  0x3d   : > { %v780_v38 = vsel %vm772_vm5, 16843009, %v2172_v19  ;;  %v795_v45 = vunpack.c.1.s8 %v779_v37  ;;  %v797_v59 = vunpack.c.2.s8 %v779_v37 }
  0x3e   : > { %v794_v42 = vunpack.c.0.s8 %v780_v38  ;;  %v800_v7 = vunpack.c.3.s8 %v780_v38 }
  0x42   : > { %1855 = vmatpush3.bf16.xpose.msk.msra.mxu0 %vm2293_vm1, %v1853_v34 }
  0x43   : > { %1858 = vmatprep.subr.msk.bf16.mxu0 %vm2293_vm1, %v1856_v35 }
  0x4a   : > { %1861 = vmatpush3.bf16.xpose.msk.msra.mxu0 %vm2293_vm1, %v1859_v40 }
  0x4b   : > { %1864 = vmatprep.subr.msk.bf16.mxu0 %vm2293_vm1, %v1862_v41  ;;  %v793_v41 = vunpack.c.0.s8 %v779_v37 }
  0x4d   : > { %v825_v49 = vpack.c.b16 %v794_v42, %v793_v41 }
  0x4f   : > { %v826_v57 = vpack.c.b8 %v825_v49, %v825_v49  ;;  %v445_v49 = vld [vmem:[%s2424_s10 + $0x30] sm:$0xff] }
  0x52   : > { %1867 = vmatpush3.bf16.xpose.msk.msra.mxu0 %vm2293_vm1, %v1865_v46  ;;  %v796_v46 = vunpack.c.1.s8 %v780_v38 }
  0x53   : > { %1870 = vmatprep.subr.msk.bf16.mxu0 %vm2293_vm1, %v1868_v47 }
  0x5a   : > { %1873 = vmatpush3.bf16.xpose.msk.msra.mxu0 %vm2293_vm1, %v1871_v50  ;;  %vm853_vm1 = vnez %v826_v57 }
  0x5b   : > { %v869_v18 = vsel %vm853_vm1, 16843009, %v2172_v19 }
  0x61   : > { %1715 = vmatmul.mubr.msk.f32.vlgmr.msra.gmra.mrb[0].mxu0 %vm463_vm0, %v447_v17  ;;  %v439_v17 = vld [vmem:[%s2424_s10] sm:$0xff] }
  0x62   : > { %1716 = vmatprep.mubr.msk.f32.mxu0 %vm463_vm0, %v448_v52  ;;  %vm769_vm2 = vnez %v439_v17 }
  0x63   : > { %v777_v20 = vsel %vm769_vm2, 16843009, %v2172_v19 }
  0x64   : > { %v785_v22 = vunpack.c.0.s8 %v777_v20  ;;  %v787_v24 = vunpack.c.1.s8 %v777_v20  ;;  %v789_v30 = vunpack.c.2.s8 %v777_v20  ;;  %v791_v35 = vunpack.c.3.s8 %v777_v20 }
  0x65   : > { %1717 = vmatmul.mubr.msk.f32.gmra.mrb[2].mxu0 %vm463_vm0, %v448_v52 }
  0x66   : > { %1718 = vmatprep.mubr.msk.f32.mxu0 %vm463_vm0, %v449_v54  ;;  %v817_v26 = vpack.c.b16 %v786_v23, %v785_v22  ;;  %v819_v27 = vpack.c.b16 %v788_v25, %v787_v24  ;;  %v821_v34 = vpack.c.b16 %v790_v31, %v789_v30  ;;  %v823_v40 = vpack.c.b16 %v792_v36, %v791_v35 }
  0x67   : > { %v889_v30 = vunpack.c.0.s8 %v869_v18  ;;  %v890_v31 = vunpack.c.1.s8 %v869_v18 }
  0x68   : > { %v818_v32 = vpack.c.b8 %v817_v26, %v817_v26  ;;  %v820_v33 = vpack.c.b8 %v819_v27, %v819_v27  ;;  %v822_v39 = vpack.c.b8 %v821_v34, %v821_v34  ;;  %v824_v48 = vpack.c.b8 %v823_v40, %v823_v40 }
  0x69   : > { %1719 = vmatmul.mubr.msk.f32.gmra.mrb[4].mxu0 %vm463_vm0, %v449_v54  ;;  %v827_v54 = vpack.c.b16 %v796_v46, %v795_v45 }
  0x6a   : > { %1720 = vmatprep.mubr.msk.f32.mxu0 %vm463_vm0, %v450_v56  ;;  %vm849_vm6 = vnez %v818_v32  ;;  %vm850_vm7 = vnez %v820_v33  ;;  %vm851_vm8 = vnez %v822_v39  ;;  %vm852_vm10 = vnez %v824_v48 }
  0x6b   : > { %v865_v43 = vsel %vm849_vm6, 16843009, %v2172_v19  ;;  %v866_v44 = vsel %vm850_vm7, 16843009, %v2172_v19  ;;  %v867_v53 = vsel %vm851_vm8, 16843009, %v2172_v19 }
  0x6c   : > { %v881_v47 = vunpack.c.0.s8 %v865_v43  ;;  %v882_v50 = vunpack.c.1.s8 %v865_v43  ;;  %v883_v51 = vunpack.c.0.s8 %v866_v44  ;;  %v884_v52 = vunpack.c.1.s8 %v866_v44 }
  0x6d   : > { %1721 = vmatmul.mubr.msk.f32.gmra.mrb[6].mxu0 %vm463_vm0, %v450_v56  ;;  %v444_v56 = vld [vmem:[%s2424_s10 + $0x28] sm:$0xff]  ;;  %v885_v63 = vunpack.c.0.s8 %v867_v53  ;;  %v868_v3 = vsel %vm852_vm10, 16843009, %v2172_v19  ;;  %vm921_vm8 = vcmp.ne.s32.totalorder %v889_v30, 0 }
  0x6e   : > { %1722 = vmatprep.mubr.msk.f32.mxu0 %vm463_vm0, %v451_v58  ;;  %vm913_vm9 = vcmp.ne.s32.totalorder %v881_v47, 0  ;;  %vm914_vm11 = vcmp.ne.s32.totalorder %v882_v50, 0  ;;  %vm2439_vm12 = vcmp.ne.s32.totalorder %v883_v51, 0  ;;  %vm2443_vm13 = vcmp.ne.s32.totalorder %v884_v52, 0  ;;  %v446_v50 = vld [vmem:[%s2424_s10 + $0x38] sm:$0xff]  ;;  %s1676_s10 = sshll.u32 %s1437_s9, 7 }
  0x6f   : > { %vm774_vm15 = vnez %v444_v56  ;;  %vm2460_vm2 = vcmp.ne.s32.totalorder %v885_v63, 0  ;;  %v888_v17 = vunpack.c.1.s8 %v868_v3  ;;  %s2874_s14 = scalar_lea.hbm %s2976_s5, %s1676_s10 }
  0x70   : > { %v2458_v11 = vsel %vm774_vm15, 16843009, %v2172_v19 }
  0x71   : > { %1723 = vmatmul.mubr.msk.f32.gmra.mrb[8].mxu0 %vm463_vm0, %v451_v58  ;;  %v802_v23 = vunpack.c.0.s8 %v2458_v11  ;;  %vm920_vm6 = vcmp.ne.s32.totalorder %v888_v17, 0 }
  0x72   : > { %1724 = vmatprep.mubr.msk.f32.mxu0 %vm463_vm0, %v452_v60 }
  0x75   : > { %1725 = vmatmul.mubr.msk.f32.gmra.mrb[10].mxu0 %vm463_vm0, %v452_v60  ;;  %v798_v60 = vunpack.c.2.s8 %v780_v38  ;;  %v804_v38 = vunpack.c.1.s8 %v2458_v11 }
  0x76   : > { %1726 = vmatprep.mubr.msk.f32.mxu0 %vm463_vm0, %v453_v62 }
  0x77   : > { %v829_v9 = vpack.c.b16 %v798_v60, %v797_v59 }
  0x79   : > { %1727 = vmatmul.mubr.msk.f32.gmra.mrb[12].mxu0 %vm463_vm0, %v453_v62  ;;  %v830_v25 = vpack.c.b8 %v829_v9, %v829_v9 }
  0x7a   : > { %1728 = vmatprep.mubr.msk.f32.mxu0 %vm463_vm0, %v454_v0 }
  0x7b   : > { %vm855_vm7 = vnez %v830_v25 }
  0x7c   : > { %v871_v46 = vsel %vm855_vm7, 16843009, %v2172_v19 }
  0x7d   : > { %1729 = vmatmul.mubr.msk.f32.gmra.mrb[14].mxu0 %vm463_vm0, %v454_v0  ;;  %v893_v59 = vunpack.c.0.s8 %v871_v46  ;;  %v894_v62 = vunpack.c.1.s8 %v871_v46 }
  0x7e   : > { %1730 = vmatprep.mubr.msk.f32.mxu0 %vm463_vm0, %v455_v2 }
  0x7f   : > { %vm925_vm1 = vcmp.ne.s32.totalorder %v893_v59, 0 }
  0x81   : > { %1731 = vmatmul.mubr.msk.f32.gmra.mrb[16].mxu0 %vm463_vm0, %v455_v2  ;;  %v886_v2 = vunpack.c.1.s8 %v867_v53 }
  0x82   : > { %1732 = vmatprep.mubr.msk.f32.mxu0 %vm463_vm0, %v456_v4 }
  0x83   : > { %vm918_vm4 = vcmp.ne.s32.totalorder %v886_v2, 0 }
  0x85   : > { %1733 = vmatmul.mubr.msk.f32.gmra.mrb[18].mxu0 %vm463_vm0, %v456_v4  ;;  %v828_v4 = vpack.c.b8 %v827_v54, %v827_v54  ;;  %v806_v54 = vunpack.c.2.s8 %v2458_v11 }
  0x86   : > { %1734 = vmatprep.mubr.msk.f32.mxu0 %vm463_vm0, %v457_v6 }
  0x87   : > { %vm854_vm3 = vnez %v828_v4 }
  0x88   : > { %v870_v32 = vsel %vm854_vm3, 16843009, %v2172_v19 }
  0x89   : > { %1735 = vmatmul.mubr.msk.f32.gmra.mrb[20].mxu0 %vm463_vm0, %v457_v6  ;;  %v799_v6 = vunpack.c.3.s8 %v779_v37  ;;  %v891_v40 = vunpack.c.0.s8 %v870_v32  ;;  %v892_v44 = vunpack.c.1.s8 %v870_v32 }
  0x8a   : > { %1736 = vmatprep.mubr.msk.f32.mxu0 %vm463_vm0, %v458_v8 }
  0x8b   : > { %v831_v21 = vpack.c.b16 %v800_v7, %v799_v6 }
  0x8d   : > { %1737 = vmatmul.mubr.msk.f32.gmra.mrb[22].mxu0 %vm463_vm0, %v458_v8  ;;  %v832_v34 = vpack.c.b8 %v831_v21, %v831_v21 }
  0x8e   : > { %1738 = vmatprep.mubr.msk.f32.mxu0 %vm463_vm0, %v459_v10 }
  0x8f   : > { %vm2503_vm10 = vnez %v832_v34 }
  0x90   : > { %v872_v63 = vsel %vm2503_vm10, 16843009, %v2172_v19 }
  0x91   : > { %1739 = vmatmul.mubr.msk.f32.gmra.mrb[24].mxu0 %vm463_vm0, %v459_v10  ;;  %v2455_v10 = vsel %vm773_vm14, 16843009, %v2172_v19  ;;  %vm2523_vm14 = vcmp.ne.s32.totalorder %v892_v44, 0 }
  0x92   : > { %1740 = vmatprep.mubr.msk.f32.mxu0 %vm463_vm0, %v460_v12  ;;  %v801_v22 = vunpack.c.0.s8 %v2455_v10  ;;  %v803_v37 = vunpack.c.1.s8 %v2455_v10  ;;  %v805_v53 = vunpack.c.2.s8 %v2455_v10  ;;  %v807_v7 = vunpack.c.3.s8 %v2455_v10 }
  0x93   : > { %v895_v10 = vunpack.c.0.s8 %v872_v63 }
  0x94   : > { %v833_v35 = vpack.c.b16 %v802_v23, %v801_v22  ;;  %v835_v52 = vpack.c.b16 %v804_v38, %v803_v37  ;;  %v837_v4 = vpack.c.b16 %v806_v54, %v805_v53 }
  0x95   : > { %1741 = vmatmul.mubr.msk.f32.gmra.mrb[26].mxu0 %vm463_vm0, %v460_v12 }
  0x96   : > { %1742 = vmatprep.mubr.msk.f32.mxu0 %vm463_vm0, %v461_v14  ;;  %v834_v48 = vpack.c.b8 %v833_v35, %v833_v35 }
  0x98   : > { %vm2532_vm15 = vnez %v834_v48 }
  0x99   : > { %1743 = vmatmul.mubr.msk.f32.gmra.mrb[28].mxu0 %vm463_vm0, %v461_v14  ;;  %v887_v14 = vunpack.c.0.s8 %v868_v3  ;;  %v836_v3 = vpack.c.b8 %v835_v52, %v835_v52  ;;  %v873_v18 = vsel %vm2532_vm15, 16843009, %v2172_v19 }
  0x9a   : > { %1744 = vmatprep.mubr.msk.f32.mxu0 %vm463_vm0, %v462_v16  ;;  %v897_v30 = vunpack.c.0.s8 %v873_v18  ;;  %v898_v32 = vunpack.c.1.s8 %v873_v18 }
  0x9b   : > { %vm2477_vm5 = vcmp.ne.s32.totalorder %v887_v14, 0  ;;  %vm858_vm3 = vnez %v836_v3 }
  0x9c   : > { %v874_v34 = vsel %vm858_vm3, 16843009, %v2172_v19  ;;  %vm929_vm7 = vcmp.ne.s32.totalorder %v897_v30, 0 }
  0x9d   : > { %1745 = vmatmul.mubr.msk.f32.gmra.mrb[30].mxu0 %vm463_vm0, %v462_v16  ;;  %v899_v44 = vunpack.c.0.s8 %v874_v34  ;;  %v900_v46 = vunpack.c.1.s8 %v874_v34 }
  0x9f   : > { %vm931_vm10 = vcmp.ne.s32.totalorder %v899_v44, 0 }
 0x134   : > { %v674_v61 = vpop.f32.mrb[0].mxu0 }
 0x135   : > { %v2447_v0 = vsel %vm913_vm9, -1e+09, %v674_v61  ;;  %v676_v1 = vpop.f32.mrb[1].mxu0  ;;  %vm2496_vm9 = vcmp.ne.s32.totalorder %v890_v31, 0 }
 0x136   : > { %v2450_v5 = vsel %vm914_vm11, -1e+09, %v676_v1  ;;  %vm2513_vm11 = vcmp.ne.s32.totalorder %v891_v40, 0 }
 0x137   : > { %v977_v8 = vmax.f32 %v2447_v0, %v2450_v5 }
 0x138   : > { %v680_v12 = vpop.f32.mrb[2].mxu0 }
 0x139   : > { %v2466_v15 = vsel %vm2439_vm12, -1e+09, %v680_v12  ;;  %978 = vmax.xlane.f32.xlu0 %v977_v8  ;;  %v682_v16 = vpop.f32.mrb[3].mxu0  ;;  %vm775_vm12 = vnez %v445_v49  ;;  %v808_v8 = vunpack.c.3.s8 %v2458_v11  ;;  %v896_v11 = vunpack.c.1.s8 %v872_v63 }
 0x13a   : > { %v2471_v20 = vsel %vm2443_vm13, -1e+09, %v682_v16  ;;  %vm776_vm13 = vnez %v446_v50  ;;  %v2539_v9 = vsel %vm775_vm12, 16843009, %v2172_v19 }
 0x13b   : > { %v980_v24 = vmax.f32 %v2466_v15, %v2471_v20  ;;  %v2542_v12 = vsel %vm776_vm13, 16843009, %v2172_v19  ;;  %v809_v21 = vunpack.c.0.s8 %v2539_v9  ;;  %v839_v25 = vpack.c.b16 %v808_v8, %v807_v7 }
 0x13c   : > { %v686_v26 = vpop.f32.mrb[4].mxu0  ;;  %v810_v22 = vunpack.c.0.s8 %v2542_v12  ;;  %v811_v38 = vunpack.c.1.s8 %v2539_v9  ;;  %v813_v52 = vunpack.c.2.s8 %v2539_v9  ;;  %v814_v53 = vunpack.c.2.s8 %v2542_v12 }
 0x13d   : > { %v2483_v28 = vsel %vm2460_vm2, -1e+09, %v686_v26  ;;  %981 = vmax.xlane.f32.xlu0 %v980_v24  ;;  %v688_v29 = vpop.f32.mrb[5].mxu0  ;;  %vm926_vm2 = vcmp.ne.s32.totalorder %v894_v62, 0  ;;  %v838_v24 = vpack.c.b8 %v837_v4, %v837_v4  ;;  %v840_v37 = vpack.c.b8 %v839_v25, %v839_v25 }
 0x13e   : > { %v2486_v33 = vsel %vm918_vm4, -1e+09, %v688_v29  ;;  %vm927_vm4 = vcmp.ne.s32.totalorder %v895_v10, 0  ;;  %v841_v35 = vpack.c.b16 %v810_v22, %v809_v21  ;;  %v845_v2 = vpack.c.b16 %v814_v53, %v813_v52 }
 0x13f   : > { %v983_v36 = vmax.f32 %v2483_v28, %v2486_v33  ;;  %v815_v3 = vunpack.c.3.s8 %v2539_v9  ;;  %v816_v4 = vunpack.c.3.s8 %v2542_v12 }
 0x140   : > { %v692_v39 = vpop.f32.mrb[6].mxu0  ;;  %v842_v49 = vpack.c.b8 %v841_v35, %v841_v35  ;;  %v846_v9 = vpack.c.b8 %v845_v2, %v845_v2 }
 0x141   : > { %v2494_v41 = vsel %vm2477_vm5, -1e+09, %v692_v39  ;;  %984 = vmax.xlane.f32.xlu1 %v983_v36  ;;  %v694_v42 = vpop.f32.mrb[7].mxu0  ;;  %vm928_vm5 = vcmp.ne.s32.totalorder %v896_v11, 0  ;;  %v812_v39 = vunpack.c.1.s8 %v2542_v12  ;;  %v847_v21 = vpack.c.b16 %v816_v4, %v815_v3 }
 0x142   : > { %v2500_v45 = vsel %vm920_vm6, -1e+09, %v694_v42  ;;  %vm859_vm6 = vnez %v838_v24  ;;  %vm861_vm12 = vnez %v842_v49  ;;  %vm863_vm3 = vnez %v846_v9  ;;  %v424_v9 = vld [vmem:[%s2637_s16 + $0x88] sm:$0xff] }
 0x143   : > { %v986_v51 = vmax.f32 %v2494_v41, %v2500_v45  ;;  %v875_v48 = vsel %vm859_vm6, 16843009, %v2172_v19 }
 0x144   : > { %v698_v55 = vpop.f32.mrb[8].mxu0  ;;  %v902_v61 = vunpack.c.1.s8 %v875_v48 }
 0x145   : > { %v2517_v57 = vsel %vm921_vm8, -1e+09, %v698_v55  ;;  %987 = vmax.xlane.f32.xlu1 %v986_v51  ;;  %v700_v58 = vpop.f32.mrb[9].mxu0  ;;  %vm930_vm8 = vcmp.ne.s32.totalorder %v898_v32, 0  ;;  %v843_v51 = vpack.c.b16 %v812_v39, %v811_v38  ;;  %v848_v32 = vpack.c.b8 %v847_v21, %v847_v21  ;;  %v407_v21 = vld [vmem:[%s2637_s16] sm:$0xff] }
 0x146   : > { %v2521_v60 = vsel %vm2496_vm9, -1e+09, %v700_v58  ;;  %vm860_vm9 = vnez %v840_v37  ;;  %v901_v58 = vunpack.c.0.s8 %v875_v48 }
 0x147   : > { %v989_v1 = vmax.f32 %v2517_v57, %v2521_v60  ;;  %v876_v62 = vsel %vm860_vm9, 16843009, %v2172_v19  ;;  %vm864_vm6 = vnez %v848_v32  ;;  %v409_v32 = vld [vmem:[%s2637_s16 + $0x10] sm:$0xff] }
 0x148   : > { %v704_v6 = vpop.f32.mrb[10].mxu0  ;;  %vm933_vm13 = vcmp.ne.s32.totalorder %v901_v58, 0  ;;  %v904_v11 = vunpack.c.1.s8 %v876_v62  ;;  %v880_v52 = vsel %vm864_vm6, 16843009, %v2172_v19 }
 0x149   : > { %v2546_v13 = vsel %vm2513_vm11, -1e+09, %v704_v6  ;;  %990 = vmax.xlane.f32.xlu0 %v989_v1  ;;  %v706_v14 = vpop.f32.mrb[11].mxu0  ;;  %vm932_vm11 = vcmp.ne.s32.totalorder %v900_v46, 0  ;;  %v844_v1 = vpack.c.b8 %v843_v51, %v843_v51 }
 0x14a   : > { %v2550_v16 = vsel %vm2523_vm14, -1e+09, %v706_v14  ;;  %v903_v14 = vunpack.c.0.s8 %v876_v62  ;;  %vm934_vm14 = vcmp.ne.s32.totalorder %v902_v61, 0  ;;  %v911_v61 = vunpack.c.0.s8 %v880_v52 }
 0x14b   : > { %v992_v17 = vmax.f32 %v2546_v13, %v2550_v16  ;;  %vm862_vm15 = vnez %v844_v1 }
 0x14c   : > { %v710_v23 = vpop.f32.mrb[12].mxu0  ;;  %v878_v30 = vsel %vm862_vm15, 16843009, %v2172_v19 }
 0x14d   : > { %v2559_v26 = vsel %vm925_vm1, -1e+09, %v710_v23  ;;  %993 = vmax.xlane.f32.xlu1 %v992_v17  ;;  %v712_v27 = vpop.f32.mrb[13].mxu0  ;;  %v877_v17 = vsel %vm861_vm12, 16843009, %v2172_v19  ;;  %vm935_vm1 = vcmp.ne.s32.totalorder %v903_v14, 0  ;;  %v907_v37 = vunpack.c.0.s8 %v878_v30 }
 0x14e   : > { %v2561_v29 = vsel %vm926_vm2, -1e+09, %v712_v27  ;;  %v905_v24 = vunpack.c.0.s8 %v877_v17  ;;  %vm936_vm2 = vcmp.ne.s32.totalorder %v904_v11, 0  ;;  %v906_v27 = vunpack.c.1.s8 %v877_v17 }
 0x14f   : > { %v995_v31 = vmax.f32 %v2559_v26, %v2561_v29  ;;  %v908_v39 = vunpack.c.1.s8 %v878_v30 }
 0x150   : > { %v716_v36 = vpop.f32.mrb[14].mxu0 }
 0x151   : > { %v2568_v40 = vsel %vm927_vm4, -1e+09, %v716_v36  ;;  %996 = vmax.xlane.f32.xlu0 %v995_v31  ;;  %v718_v42 = vpop.f32.mrb[15].mxu0  ;;  %vm937_vm4 = vcmp.ne.s32.totalorder %v905_v24, 0  ;;  %v408_v24 = vld [vmem:[%s2637_s16 + $0x8] sm:$0xff] }
 0x152   : > { %v2570_v43 = vsel %vm928_vm5, -1e+09, %v718_v42  ;;  %vm938_vm5 = vcmp.ne.s32.totalorder %v906_v27, 0  ;;  %v879_v42 = vsel %vm863_vm3, 16843009, %v2172_v19  ;;  %v426_v27 = vld [vmem:[%s2637_s16 + $0x98] sm:$0xff]  ;;  %v1876_v30 = vpack.c.bf16 %v408_v24, %v407_v21 }
 0x153   : > { %v998_v47 = vmax.f32 %v2568_v40, %v2570_v43  ;;  %v909_v49 = vunpack.c.0.s8 %v879_v42  ;;  %v910_v51 = vunpack.c.1.s8 %v879_v42 }
 0x154   : > { %v722_v50 = vpop.f32.mrb[16].mxu0 }
 0x155   : > { %v2577_v54 = vsel %vm929_vm7, -1e+09, %v722_v50  ;;  %999 = vmax.xlane.f32.xlu1 %v998_v47  ;;  %v724_v55 = vpop.f32.mrb[17].mxu0  ;;  %vm939_vm7 = vcmp.ne.s32.totalorder %v907_v37, 0  ;;  %vm941_vm9 = vcmp.ne.s32.totalorder %v909_v49, 0  ;;  %v427_v37 = vld [vmem:[%s2637_s16 + $0xa0] sm:$0xff] }
 0x156   : > { %v2579_v56 = vsel %vm930_vm8, -1e+09, %v724_v55  ;;  %vm940_vm8 = vcmp.ne.s32.totalorder %v908_v39, 0  ;;  %v429_v49 = vld [vmem:[%s2637_s16 + $0xb0] sm:$0xff] }
 0x157   : > { %v1001_v59 = vmax.f32 %v2577_v54, %v2579_v56 }
 0x158   : > { %v728_v63 = vpop.f32.mrb[18].mxu0 }
 0x159   : > { %v2586_v6 = vsel %vm931_vm10, -1e+09, %v728_v63  ;;  %1002 = vmax.xlane.f32.xlu0 %v1001_v59  ;;  %v730_v7 = vpop.f32.mrb[19].mxu0  ;;  %vm942_vm10 = vcmp.ne.s32.totalorder %v910_v51, 0  ;;  %v912_v63 = vunpack.c.1.s8 %v880_v52 }
 0x15a   : > { %v2588_v8 = vsel %vm932_vm11, -1e+09, %v730_v7  ;;  %vm943_vm11 = vcmp.ne.s32.totalorder %v911_v61, 0  ;;  %v431_v61 = vld [vmem:[%s2637_s16 + $0xc0] sm:$0xff] }
 0x15b   : > { %v1004_v10 = vmax.f32 %v2586_v6, %v2588_v8  ;;  %vm944_vm12 = vcmp.ne.s32.totalorder %v912_v63, 0 }
 0x15c   : > { %v734_v18 = vpop.f32.mrb[20].mxu0 }
 0x15d   : > { %v2593_v12 = vsel %vm933_vm13, -1e+09, %v734_v18  ;;  %1005 = vmax.xlane.f32.xlu1 %v1004_v10  ;;  %v736_v22 = vpop.f32.mrb[21].mxu0  ;;  %v423_v18 = vld [vmem:[%s2637_s16 + $0x80] sm:$0xff] }
 0x15e   : > { %v2595_v23 = vsel %vm934_vm14, -1e+09, %v736_v22  ;;  %v1874_v22 = vpack.c.bf16 %v424_v9, %v423_v18 }
 0x15f   : > { %v1007_v25 = vmax.f32 %v2593_v12, %v2595_v23 }
 0x160   : > { %v740_v31 = vpop.f32.mrb[22].mxu0  ;;  %1875 = vmatprep.subr.bf16.mxu1 %v1874_v22 }
 0x161   : > { %v2600_v34 = vsel %vm935_vm1, -1e+09, %v740_v31  ;;  %1008 = vmax.xlane.f32.xlu0 %v1007_v25  ;;  %v742_v35 = vpop.f32.mrb[23].mxu0  ;;  %v425_v25 = vld [vmem:[%s2637_s16 + $0x90] sm:$0xff]  ;;  %1877 = vmatpush3.bf16.msra.mxu1 %v1876_v30 }
 0x162   : > { %v2602_v36 = vsel %vm936_vm2, -1e+09, %v742_v35  ;;  %v1878_v31 = vpack.c.bf16 %v426_v27, %v425_v25  ;;  %v410_v35 = vld [vmem:[%s2637_s16 + $0x18] sm:$0xff] }
 0x163   : > { %v1010_v38 = vmax.f32 %v2600_v34, %v2602_v36  ;;  %v1880_v39 = vpack.c.bf16 %v410_v35, %v409_v32 }
 0x164   : > { %v746_v44 = vpop.f32.mrb[24].mxu0  ;;  %1879 = vmatprep.subr.bf16.mxu1 %v1878_v31 }
 0x165   : > { %v2607_v46 = vsel %vm937_vm4, -1e+09, %v746_v44  ;;  %1011 = vmax.xlane.f32.xlu1 %v1010_v38  ;;  %v748_v47 = vpop.f32.mrb[25].mxu0  ;;  %v428_v38 = vld [vmem:[%s2637_s16 + $0xa8] sm:$0xff]  ;;  %v411_v44 = vld [vmem:[%s2637_s16 + $0x20] sm:$0xff]  ;;  %1881 = vmatpush3.bf16.msra.mxu1 %v1880_v39 }
 0x166   : > { %v2609_v48 = vsel %vm938_vm5, -1e+09, %v748_v47  ;;  %v1882_v42 = vpack.c.bf16 %v428_v38, %v427_v37  ;;  %v412_v47 = vld [vmem:[%s2637_s16 + $0x28] sm:$0xff] }
 0x167   : > { %v1013_v50 = vmax.f32 %v2607_v46, %v2609_v48  ;;  %v1884_v51 = vpack.c.bf16 %v412_v47, %v411_v44 }
 0x168   : > { %v752_v53 = vpop.f32.mrb[26].mxu0  ;;  %1883 = vmatprep.subr.bf16.mxu1 %v1882_v42 }
 0x169   : > { %v2614_v55 = vsel %vm939_vm7, -1e+09, %v752_v53  ;;  %1014 = vmax.xlane.f32.xlu0 %v1013_v50  ;;  %v754_v58 = vpop.f32.mrb[27].mxu0  ;;  %v430_v50 = vld [vmem:[%s2637_s16 + $0xb8] sm:$0xff]  ;;  %v413_v53 = vld [vmem:[%s2637_s16 + $0x30] sm:$0xff]  ;;  %1885 = vmatpush3.bf16.msra.mxu1 %v1884_v51 }
 0x16a   : > { %v2616_v59 = vsel %vm940_vm8, -1e+09, %v754_v58  ;;  %v1886_v52 = vpack.c.bf16 %v430_v50, %v429_v49  ;;  %v414_v58 = vld [vmem:[%s2637_s16 + $0x38] sm:$0xff] }
 0x16b   : > { %v1016_v62 = vmax.f32 %v2614_v55, %v2616_v59  ;;  %v1888_v63 = vpack.c.bf16 %v414_v58, %v413_v53 }
 0x16c   : > { %v758_v1 = vpop.f32.mrb[28].mxu0  ;;  %1887 = vmatprep.subr.bf16.mxu1 %v1886_v52 }
 0x16d   : > { %v2620_v2 = vsel %vm941_vm9, -1e+09, %v758_v1  ;;  %1017 = vmax.xlane.f32.xlu1 %v1016_v62  ;;  %v760_v19 = vpop.f32.mrb[29].mxu0  ;;  %v432_v62 = vld [vmem:[%s2637_s16 + $0xc8] sm:$0xff]  ;;  %1889 = vmatpush3.bf16.msra.mxu1 %v1888_v63 }
 0x16e   : > { %v2622_v3 = vsel %vm942_vm10, -1e+09, %v760_v19  ;;  %v1890_v1 = vpack.c.bf16 %v432_v62, %v431_v61  ;;  %v415_v19 = vld [vmem:[%s2637_s16 + $0x40] sm:$0xff] }
 0x16f   : > { %v1019_v4 = vmax.f32 %v2620_v2, %v2622_v3 }
 0x170   : > { %v764_v7 = vpop.f32.mrb[30].mxu0  ;;  %1891 = vmatprep.subr.bf16.mxu1 %v1890_v1 }
 0x171   : > { %v2626_v14 = vsel %vm943_vm11, -1e+09, %v764_v7  ;;  %1020 = vmax.xlane.f32.xlu0 %v1019_v4  ;;  %v766_v10 = vpop.f32.mrb[31].mxu0  ;;  %v416_v4 = vld [vmem:[%s2637_s16 + $0x48] sm:$0xff] }
 0x172   : > { %v2628_v11 = vsel %vm944_vm12, -1e+09, %v766_v10  ;;  %v1892_v7 = vpack.c.bf16 %v416_v4, %v415_v19 }
 0x173   : > { %v1022_v17 = vmax.f32 %v2626_v14, %v2628_v11 }
 0x174   : > { %1893 = vmatpush3.bf16.msra.mxu1 %v1892_v7 }
 0x175   : > { %1023 = vmax.xlane.f32.xlu1 %v1022_v17 }
 0x1c6   : > { %v979_v10 = vpop.xlane.xlu0 %978 }
 0x1c7   : > { %v1025_v17 = vsub.f32 %v2447_v0, %v979_v10  ;;  %v1026_v18 = vsub.f32 %v2450_v5, %v979_v10 }
 0x1c9   : > { %v1057_v9 = vmul.f32 1.442695, %v1025_v17  ;;  %v1059_v21 = vmul.f32 1.442695, %v1026_v18 }
 0x1ca   : > { %v982_v22 = vpop.xlane.xlu0 %981 }
 0x1cb   : > { %1980 = vpow2.f32 %v1057_v9  ;;  %v1027_v24 = vsub.f32 %v2466_v15, %v982_v22  ;;  %v1028_v25 = vsub.f32 %v2471_v20, %v982_v22 }
 0x1cc   : > { %1982 = vpow2.f32 %v1059_v21 }
 0x1cd   : > { %v1061_v27 = vmul.f32 1.442695, %v1027_v24  ;;  %v1063_v30 = vmul.f32 1.442695, %v1028_v25 }
 0x1ce   : > { %v985_v31 = vpop.xlane.xlu1 %984 }
 0x1cf   : > { %1984 = vpow2.f32 %v1061_v27  ;;  %v1029_v32 = vsub.f32 %v2483_v28, %v985_v31  ;;  %v1030_v35 = vsub.f32 %v2486_v33, %v985_v31  ;;  %v434_v31 = vld [vmem:[%s2637_s16 + $0xd8] sm:$0xff] }
 0x1d0   : > { %1986 = vpow2.f32 %v1063_v30  ;;  %v433_v30 = vld [vmem:[%s2637_s16 + $0xd0] sm:$0xff] }
 0x1d1   : > { %v1065_v0 = vmul.f32 1.442695, %v1029_v32  ;;  %v1067_v5 = vmul.f32 1.442695, %v1030_v35  ;;  %v417_v35 = vld [vmem:[%s2637_s16 + $0x50] sm:$0xff] }
 0x1d2   : > { %v988_v37 = vpop.xlane.xlu1 %987 }
 0x1d3   : > { %1988 = vpow2.f32 %v1065_v0  ;;  %v1031_v38 = vsub.f32 %v2494_v41, %v988_v37  ;;  %v1032_v15 = vsub.f32 %v2500_v45, %v988_v37  ;;  %v418_v0 = vld [vmem:[%s2637_s16 + $0x58] sm:$0xff] }
 0x1d4   : > { %1990 = vpow2.f32 %v1067_v5  ;;  %v1894_v5 = vpack.c.bf16 %v434_v31, %v433_v30  ;;  %v1896_v37 = vpack.c.bf16 %v418_v0, %v417_v35 }
 0x1d5   : > { %v2667_v20 = vpop.eup %1980  ;;  %v1069_v39 = vmul.f32 1.442695, %v1031_v38  ;;  %v1071_v42 = vmul.f32 1.442695, %v1032_v15 }
 0x1d6   : > { %v2669_v44 = vpop.eup %1982  ;;  %v991_v47 = vpop.xlane.xlu0 %990  ;;  %1895 = vmatprep.subr.bf16.mxu1 %v1894_v5 }
 0x1d7   : > { %1992 = vpow2.f32 %v1069_v39  ;;  %v1033_v28 = vsub.f32 %v2517_v57, %v991_v47  ;;  %v1034_v33 = vsub.f32 %v2521_v60, %v991_v47  ;;  %v1121_v49 = vadd.f32 %v2669_v44, %v2667_v20  ;;  %v436_v47 = vld [vmem:[%s2637_s16 + $0xe8] sm:$0xff]  ;;  %1897 = vmatpush3.bf16.msra.mxu1 %v1896_v37 }
 0x1d8   : > { %1994 = vpow2.f32 %v1071_v42 }
 0x1d9   : > { %v2675_v41 = vpop.eup %1984  ;;  %v1073_v45 = vmul.f32 1.442695, %v1033_v28  ;;  %v1075_v50 = vmul.f32 1.442695, %v1034_v33  ;;  %1122 = vadd.xlane.f32.xlu0 %v1121_v49 }
 0x1da   : > { %v2677_v51 = vpop.eup %1986  ;;  %v994_v52 = vpop.xlane.xlu1 %993 }
 0x1db   : > { %1996 = vpow2.f32 %v1073_v45  ;;  %v1035_v53 = vsub.f32 %v2546_v13, %v994_v52  ;;  %v1036_v58 = vsub.f32 %v2550_v16, %v994_v52  ;;  %v1124_v57 = vadd.f32 %v2677_v51, %v2675_v41  ;;  %v419_v45 = vld [vmem:[%s2637_s16 + $0x60] sm:$0xff] }
 0x1dc   : > { %1998 = vpow2.f32 %v1075_v50  ;;  %v420_v50 = vld [vmem:[%s2637_s16 + $0x68] sm:$0xff] }
 0x1dd   : > { %v2683_v60 = vpop.eup %1988  ;;  %v1077_v61 = vmul.f32 1.442695, %v1035_v53  ;;  %v1079_v62 = vmul.f32 1.442695, %v1036_v58  ;;  %1125 = vadd.xlane.f32.xlu1 %v1124_v57  ;;  %v1900_v53 = vpack.c.bf16 %v420_v50, %v419_v45 }
 0x1de   : > { %v2685_v63 = vpop.eup %1990  ;;  %v997_v1 = vpop.xlane.xlu0 %996 }
 0x1df   : > { %2000 = vpow2.f32 %v1077_v61  ;;  %v1037_v19 = vsub.f32 %v2559_v26, %v997_v1  ;;  %v1038_v4 = vsub.f32 %v2561_v29, %v997_v1  ;;  %v1127_v13 = vadd.f32 %v2685_v63, %v2683_v60  ;;  %v438_v1 = vld [vmem:[%s2637_s16 + $0xf8] sm:$0xff] }
 0x1e0   : > { %2002 = vpow2.f32 %v1079_v62  ;;  %v437_v62 = vld [vmem:[%s2637_s16 + $0xf0] sm:$0xff] }
 0x1e1   : > { %v2691_v16 = vpop.eup %1992  ;;  %v1081_v7 = vmul.f32 1.442695, %v1037_v19  ;;  %v1083_v10 = vmul.f32 1.442695, %v1038_v4  ;;  %1128 = vadd.xlane.f32.xlu0 %v1127_v13 }
 0x1e2   : > { %v2693_v17 = vpop.eup %1994  ;;  %v1000_v18 = vpop.xlane.xlu1 %999 }
 0x1e3   : > { %2004 = vpow2.f32 %v1081_v7  ;;  %v1039_v9 = vsub.f32 %v2568_v40, %v1000_v18  ;;  %v1040_v26 = vsub.f32 %v2570_v43, %v1000_v18  ;;  %v1130_v29 = vadd.f32 %v2693_v17, %v2691_v16  ;;  %v421_v7 = vld [vmem:[%s2637_s16 + $0x70] sm:$0xff] }
 0x1e4   : > { %2006 = vpow2.f32 %v1083_v10  ;;  %v422_v10 = vld [vmem:[%s2637_s16 + $0x78] sm:$0xff]  ;;  %v1902_v18 = vpack.c.bf16 %v438_v1, %v437_v62 }
 0x1e5   : > { %v2699_v21 = vpop.eup %1996  ;;  %v1085_v22 = vmul.f32 1.442695, %v1039_v9  ;;  %v1087_v24 = vmul.f32 1.442695, %v1040_v26  ;;  %1131 = vadd.xlane.f32.xlu1 %v1130_v29  ;;  %v1904_v9 = vpack.c.bf16 %v422_v10, %v421_v7 }
 0x1e6   : > { %v2701_v25 = vpop.eup %1998  ;;  %v1003_v27 = vpop.xlane.xlu0 %1002 }
 0x1e7   : > { %2008 = vpow2.f32 %v1085_v22  ;;  %v1041_v40 = vsub.f32 %v2577_v54, %v1003_v27  ;;  %v1042_v43 = vsub.f32 %v2579_v56, %v1003_v27  ;;  %v1133_v32 = vadd.f32 %v2701_v25, %v2699_v21  ;;  %v435_v56 = vld [vmem:[%s2637_s16 + $0xe0] sm:$0xff] }
 0x1e8   : > { %2010 = vpow2.f32 %v1087_v24  ;;  %v1898_v52 = vpack.c.bf16 %v436_v47, %v435_v56 }
 0x1e9   : > { %v2711_v38 = vpop.eup %2000  ;;  %v1089_v15 = vmul.f32 1.442695, %v1041_v40  ;;  %v1091_v39 = vmul.f32 1.442695, %v1042_v43  ;;  %1134 = vadd.xlane.f32.xlu0 %v1133_v32 }
 0x1ea   : > { %v2713_v42 = vpop.eup %2002  ;;  %v1006_v54 = vpop.xlane.xlu1 %1005  ;;  %1899 = vmatprep.subr.bf16.mxu1 %v1898_v52 }
 0x1eb   : > { %2012 = vpow2.f32 %v1089_v15  ;;  %v1043_v28 = vsub.f32 %v2586_v6, %v1006_v54  ;;  %v1044_v33 = vsub.f32 %v2588_v8, %v1006_v54  ;;  %v1136_v49 = vadd.f32 %v2713_v42, %v2711_v38  ;;  %1901 = vmatpush3.bf16.msra.mxu1 %v1900_v53 }
 0x1ec   : > { %2014 = vpow2.f32 %v1091_v39  ;;  %1903 = vmatprep.subr.bf16.mxu1 %v1902_v18 }
 0x1ed   : > { %v2723_v58 = vpop.eup %2004  ;;  %v1093_v57 = vmul.f32 1.442695, %v1043_v28  ;;  %v1095_v61 = vmul.f32 1.442695, %v1044_v33  ;;  %1137 = vadd.xlane.f32.xlu1 %v1136_v49 }
 0x1ee   : > { %v2725_v6 = vpop.eup %2006  ;;  %v1009_v8 = vpop.xlane.xlu0 %1008 }
 0x1ef   : > { %2016 = vpow2.f32 %v1093_v57  ;;  %v1045_v19 = vsub.f32 %v2593_v12, %v1009_v8  ;;  %v1046_v4 = vsub.f32 %v2595_v23, %v1009_v8  ;;  %v1139_v13 = vadd.f32 %v2725_v6, %v2723_v58  ;;  %1905 = vmatpush3.bf16.msra.mxu1 %v1904_v9 }
 0x1f0   : > { %2018 = vpow2.f32 %v1095_v61 }
 0x1f1   : > { %v2735_v26 = vpop.eup %2008  ;;  %v1097_v29 = vmul.f32 1.442695, %v1045_v19  ;;  %v1099_v22 = vmul.f32 1.442695, %v1046_v4  ;;  %1140 = vadd.xlane.f32.xlu0 %v1139_v13 }
 0x1f2   : > { %v2737_v24 = vpop.eup %2010  ;;  %v1012_v27 = vpop.xlane.xlu1 %1011 }
 0x1f3   : > { %2020 = vpow2.f32 %v1097_v29  ;;  %v1047_v12 = vsub.f32 %v2600_v34, %v1012_v27  ;;  %v1048_v23 = vsub.f32 %v2602_v36, %v1012_v27  ;;  %v1142_v30 = vadd.f32 %v2737_v24, %v2735_v26 }
 0x1f4   : > { %2022 = vpow2.f32 %v1099_v22 }
 0x1f5   : > { %v2743_v31 = vpop.eup %2012  ;;  %v1101_v40 = vmul.f32 1.442695, %v1047_v12  ;;  %v1103_v43 = vmul.f32 1.442695, %v1048_v23  ;;  %1143 = vadd.xlane.f32.xlu1 %v1142_v30 }
 0x1f6   : > { %v2745_v32 = vpop.eup %2014  ;;  %v1015_v35 = vpop.xlane.xlu0 %1014 }
 0x1f7   : > { %2024 = vpow2.f32 %v1101_v40  ;;  %v1049_v0 = vsub.f32 %v2607_v46, %v1015_v35  ;;  %v1050_v34 = vsub.f32 %v2609_v48, %v1015_v35  ;;  %v1145_v36 = vadd.f32 %v2745_v32, %v2743_v31 }
 0x1f8   : > { %2026 = vpow2.f32 %v1103_v43 }
 0x1f9   : > { %v2751_v5 = vpop.eup %2016  ;;  %v1105_v37 = vmul.f32 1.442695, %v1049_v0  ;;  %v1107_v15 = vmul.f32 1.442695, %v1050_v34  ;;  %1146 = vadd.xlane.f32.xlu0 %v1145_v36 }
 0x1fa   : > { %v2753_v39 = vpop.eup %2018  ;;  %v1018_v54 = vpop.xlane.xlu1 %1017 }
 0x1fb   : > { %2028 = vpow2.f32 %v1105_v37  ;;  %v1051_v56 = vsub.f32 %v2614_v55, %v1018_v54  ;;  %v1052_v47 = vsub.f32 %v2616_v59, %v1018_v54  ;;  %v1148_v46 = vadd.f32 %v2753_v39, %v2751_v5 }
 0x1fc   : > { %2030 = vpow2.f32 %v1107_v15 }
 0x1fd   : > { %v2759_v48 = vpop.eup %2020  ;;  %v1109_v28 = vmul.f32 1.442695, %v1051_v56  ;;  %v1111_v33 = vmul.f32 1.442695, %v1052_v47  ;;  %1149 = vadd.xlane.f32.xlu1 %v1148_v46 }
 0x1fe   : > { %v2761_v49 = vpop.eup %2022  ;;  %v1021_v45 = vpop.xlane.xlu0 %1020 }
 0x1ff   : > { %2032 = vpow2.f32 %v1109_v28  ;;  %v1053_v50 = vsub.f32 %v2620_v2, %v1021_v45  ;;  %v1054_v52 = vsub.f32 %v2622_v3, %v1021_v45  ;;  %v1151_v55 = vadd.f32 %v2761_v49, %v2759_v48 }
 0x200   : > { %2034 = vpow2.f32 %v1111_v33 }
 0x201   : > { %v2767_v59 = vpop.eup %2024  ;;  %v1113_v53 = vmul.f32 1.442695, %v1053_v50  ;;  %v1115_v57 = vmul.f32 1.442695, %v1054_v52  ;;  %1152 = vadd.xlane.f32.xlu0 %v1151_v55 }
 0x202   : > { %v2769_v61 = vpop.eup %2026  ;;  %v1024_v8 = vpop.xlane.xlu1 %1023 }
 0x203   : > { %2036 = vpow2.f32 %v1113_v53  ;;  %v1055_v62 = vsub.f32 %v2626_v14, %v1024_v8  ;;  %v1056_v1 = vsub.f32 %v2628_v11, %v1024_v8  ;;  %v1154_v2 = vadd.f32 %v2769_v61, %v2767_v59 }
 0x204   : > { %2038 = vpow2.f32 %v1115_v57 }
 0x205   : > { %v2775_v3 = vpop.eup %2028  ;;  %v1117_v19 = vmul.f32 1.442695, %v1055_v62  ;;  %v1119_v4 = vmul.f32 1.442695, %v1056_v1  ;;  %1155 = vadd.xlane.f32.xlu1 %v1154_v2 }
 0x206   : > { %v2777_v13 = vpop.eup %2030 }
 0x207   : > { %2040 = vpow2.f32 %v1117_v19  ;;  %v1157_v7 = vadd.f32 %v2777_v13, %v2775_v3 }
 0x208   : > { %2042 = vpow2.f32 %v1119_v4 }
 0x209   : > { %v2781_v10 = vpop.eup %2032  ;;  %1158 = vadd.xlane.f32.xlu0 %v1157_v7 }
 0x20a   : > { %v2783_v14 = vpop.eup %2034 }
 0x20b   : > { %v1160_v11 = vadd.f32 %v2783_v14, %v2781_v10 }
 0x20d   : > { %v2787_v18 = vpop.eup %2036  ;;  %1161 = vadd.xlane.f32.xlu1 %v1160_v11 }
 0x20e   : > { %v2789_v9 = vpop.eup %2038 }
 0x20f   : > { %v1163_v29 = vadd.f32 %v2789_v9, %v2787_v18 }
 0x211   : > { %v2793_v22 = vpop.eup %2040  ;;  %1164 = vadd.xlane.f32.xlu0 %v1163_v29 }
 0x212   : > { %v2795_v27 = vpop.eup %2042 }
 0x213   : > { %v1166_v12 = vadd.f32 %v2795_v27, %v2793_v22 }
 0x215   : > { %1167 = vadd.xlane.f32.xlu1 %v1166_v12 }
 0x266   : > { %v1123_v23 = vpop.xlane.xlu0 %1122 }
 0x267   : > { %2044 = vrcp.f32 %v1123_v23 }
 0x26a   : > { %v1126_v30 = vpop.xlane.xlu1 %1125 }
 0x26b   : > { %2046 = vrcp.f32 %v1126_v30 }
 0x26e   : > { %v1129_v40 = vpop.xlane.xlu0 %1128 }
 0x26f   : > { %2048 = vrcp.f32 %v1129_v40 }
 0x271   : > { %v2045_v43 = vpop.eup %2044 }
 0x272   : > { %v1132_v35 = vpop.xlane.xlu1 %1131  ;;  %v1186_v0 = vmul.f32 %v2045_v43, %v2669_v44  ;;  %v1185_v34 = vmul.f32 %v2045_v43, %v2667_v20 }
 0x273   : > { %2050 = vrcp.f32 %v1132_v35 }
 0x274   : > { %1281 = vmatprep.mubr.f32.mxu1 %v1186_v0  ;;  %1363 = vst [vmem:[%s2804_s17 + $0x8] sm:$0xff] %v1186_v0  ;;  %1362 = vst [vmem:[%s2804_s17] sm:$0xff] %v1185_v34 }
 0x275   : > { %v2047_v36 = vpop.eup %2046  ;;  %1282 = vmatmul.mubr.f32.vlgmr.msra.gmra.mrb[0].mxu1 %v1185_v34 }
 0x276   : > { %v1135_v37 = vpop.xlane.xlu0 %1134  ;;  %v1188_v15 = vmul.f32 %v2047_v36, %v2677_v51  ;;  %v1187_v44 = vmul.f32 %v2047_v36, %v2675_v41 }
 0x277   : > { %2052 = vrcp.f32 %v1135_v37 }
 0x278   : > { %1286 = vmatprep.mubr.f32.mxu1 %v1188_v15  ;;  %1365 = vst [vmem:[%s2804_s17 + $0x18] sm:$0xff] %v1188_v15  ;;  %1364 = vst [vmem:[%s2804_s17 + $0x10] sm:$0xff] %v1187_v44 }
 0x279   : > { %v2049_v20 = vpop.eup %2048  ;;  %1287 = vmatmul.mubr.f32.gmra.mrb[2].mxu1 %v1187_v44 }
 0x27a   : > { %v1138_v54 = vpop.xlane.xlu1 %1137  ;;  %v1190_v56 = vmul.f32 %v2049_v20, %v2685_v63  ;;  %v1189_v47 = vmul.f32 %v2049_v20, %v2683_v60 }
 0x27b   : > { %2054 = vrcp.f32 %v1138_v54 }
 0x27c   : > { %1291 = vmatprep.mubr.f32.mxu1 %v1190_v56  ;;  %1367 = vst [vmem:[%s2804_s17 + $0x28] sm:$0xff] %v1190_v56  ;;  %1366 = vst [vmem:[%s2804_s17 + $0x20] sm:$0xff] %v1189_v47 }
 0x27d   : > { %v2051_v51 = vpop.eup %2050  ;;  %1292 = vmatmul.mubr.f32.gmra.mrb[4].mxu1 %v1189_v47 }
 0x27e   : > { %v1141_v41 = vpop.xlane.xlu0 %1140  ;;  %v1192_v46 = vmul.f32 %v2051_v51, %v2693_v17  ;;  %v1191_v28 = vmul.f32 %v2051_v51, %v2691_v16 }
 0x27f   : > { %2056 = vrcp.f32 %v1141_v41 }
 0x280   : > { %1296 = vmatprep.mubr.f32.mxu1 %v1192_v46  ;;  %1369 = vst [vmem:[%s2804_s17 + $0x38] sm:$0xff] %v1192_v46  ;;  %1368 = vst [vmem:[%s2804_s17 + $0x30] sm:$0xff] %v1191_v28 }
 0x281   : > { %v2053_v63 = vpop.eup %2052  ;;  %1297 = vmatmul.mubr.f32.gmra.mrb[6].mxu1 %v1191_v28 }
 0x282   : > { %v1144_v60 = vpop.xlane.xlu1 %1143  ;;  %v1194_v33 = vmul.f32 %v2053_v63, %v2701_v25  ;;  %v1193_v45 = vmul.f32 %v2053_v63, %v2699_v21 }
 0x283   : > { %2058 = vrcp.f32 %v1144_v60 }
 0x284   : > { %1301 = vmatprep.mubr.f32.mxu1 %v1194_v33  ;;  %1371 = vst [vmem:[%s2804_s17 + $0x48] sm:$0xff] %v1194_v33  ;;  %1370 = vst [vmem:[%s2804_s17 + $0x40] sm:$0xff] %v1193_v45 }
 0x285   : > { %v2055_v17 = vpop.eup %2054  ;;  %1302 = vmatmul.mubr.f32.gmra.mrb[8].mxu1 %v1193_v45 }
 0x286   : > { %v1147_v16 = vpop.xlane.xlu0 %1146  ;;  %v1196_v50 = vmul.f32 %v2055_v17, %v2713_v42  ;;  %v1195_v52 = vmul.f32 %v2055_v17, %v2711_v38 }
 0x287   : > { %2060 = vrcp.f32 %v1147_v16 }
 0x288   : > { %1306 = vmatprep.mubr.f32.mxu1 %v1196_v50  ;;  %1373 = vst [vmem:[%s2804_s17 + $0x58] sm:$0xff] %v1196_v50  ;;  %1372 = vst [vmem:[%s2804_s17 + $0x50] sm:$0xff] %v1195_v52 }
 0x289   : > { %v2057_v25 = vpop.eup %2056  ;;  %1307 = vmatmul.mubr.f32.gmra.mrb[10].mxu1 %v1195_v52 }
 0x28a   : > { %v1150_v21 = vpop.xlane.xlu1 %1149  ;;  %v1198_v55 = vmul.f32 %v2057_v25, %v2725_v6  ;;  %v1197_v53 = vmul.f32 %v2057_v25, %v2723_v58 }
 0x28b   : > { %2062 = vrcp.f32 %v1150_v21 }
 0x28c   : > { %1311 = vmatprep.mubr.f32.mxu1 %v1198_v55  ;;  %1375 = vst [vmem:[%s2804_s17 + $0x68] sm:$0xff] %v1198_v55  ;;  %1374 = vst [vmem:[%s2804_s17 + $0x60] sm:$0xff] %v1197_v53 }
 0x28d   : > { %v2059_v42 = vpop.eup %2058  ;;  %1312 = vmatmul.mubr.f32.gmra.mrb[12].mxu1 %v1197_v53 }
 0x28e   : > { %v1153_v38 = vpop.xlane.xlu0 %1152  ;;  %v1200_v57 = vmul.f32 %v2059_v42, %v2737_v24  ;;  %v1199_v8 = vmul.f32 %v2059_v42, %v2735_v26 }
 0x28f   : > { %2064 = vrcp.f32 %v1153_v38 }
 0x290   : > { %1316 = vmatprep.mubr.f32.mxu1 %v1200_v57  ;;  %1377 = vst [vmem:[%s2804_s17 + $0x78] sm:$0xff] %v1200_v57  ;;  %1376 = vst [vmem:[%s2804_s17 + $0x70] sm:$0xff] %v1199_v8 }
 0x291   : > { %v2061_v6 = vpop.eup %2060  ;;  %1317 = vmatmul.mubr.f32.gmra.mrb[14].mxu1 %v1199_v8 }
 0x292   : > { %v1156_v58 = vpop.xlane.xlu1 %1155  ;;  %v1202_v62 = vmul.f32 %v2061_v6, %v2745_v32  ;;  %v1201_v1 = vmul.f32 %v2061_v6, %v2743_v31 }
 0x293   : > { %2066 = vrcp.f32 %v1156_v58 }
 0x294   : > { %1321 = vmatprep.mubr.f32.mxu1 %v1202_v62  ;;  %1379 = vst [vmem:[%s2804_s17 + $0x88] sm:$0xff] %v1202_v62  ;;  %1378 = vst [vmem:[%s2804_s17 + $0x80] sm:$0xff] %v1201_v1 }
 0x295   : > { %v2063_v24 = vpop.eup %2062  ;;  %1322 = vmatmul.mubr.f32.gmra.mrb[16].mxu1 %v1201_v1 }
 0x296   : > { %v1159_v26 = vpop.xlane.xlu0 %1158  ;;  %v1204_v2 = vmul.f32 %v2063_v24, %v2753_v39  ;;  %v1203_v19 = vmul.f32 %v2063_v24, %v2751_v5 }
 0x297   : > { %2068 = vrcp.f32 %v1159_v26 }
 0x298   : > { %1326 = vmatprep.mubr.f32.mxu1 %v1204_v2  ;;  %1381 = vst [vmem:[%s2804_s17 + $0x98] sm:$0xff] %v1204_v2  ;;  %1380 = vst [vmem:[%s2804_s17 + $0x90] sm:$0xff] %v1203_v19 }
 0x299   : > { %v2065_v32 = vpop.eup %2064  ;;  %1327 = vmatmul.mubr.f32.gmra.mrb[18].mxu1 %v1203_v19 }
 0x29a   : > { %v1162_v31 = vpop.xlane.xlu1 %1161  ;;  %v1206_v4 = vmul.f32 %v2065_v32, %v2761_v49  ;;  %v1205_v7 = vmul.f32 %v2065_v32, %v2759_v48 }
 0x29b   : > { %2070 = vrcp.f32 %v1162_v31 }
 0x29c   : > { %1331 = vmatprep.mubr.f32.mxu1 %v1206_v4  ;;  %1383 = vst [vmem:[%s2804_s17 + $0xa8] sm:$0xff] %v1206_v4  ;;  %1382 = vst [vmem:[%s2804_s17 + $0xa0] sm:$0xff] %v1205_v7 }
 0x29d   : > { %v2067_v39 = vpop.eup %2066  ;;  %1332 = vmatmul.mubr.f32.gmra.mrb[20].mxu1 %v1205_v7 }
 0x29e   : > { %v1165_v5 = vpop.xlane.xlu0 %1164  ;;  %v1208_v11 = vmul.f32 %v2067_v39, %v2769_v61  ;;  %v1207_v29 = vmul.f32 %v2067_v39, %v2767_v59 }
 0x29f   : > { %2072 = vrcp.f32 %v1165_v5 }
 0x2a0   : > { %1336 = vmatprep.mubr.f32.mxu1 %v1208_v11  ;;  %1385 = vst [vmem:[%s2804_s17 + $0xb8] sm:$0xff] %v1208_v11  ;;  %1384 = vst [vmem:[%s2804_s17 + $0xb0] sm:$0xff] %v1207_v29 }
 0x2a1   : > { %v2069_v48 = vpop.eup %2068  ;;  %1337 = vmatmul.mubr.f32.gmra.mrb[22].mxu1 %v1207_v29 }
 0x2a2   : > { %v1168_v49 = vpop.xlane.xlu1 %1167  ;;  %v1210_v12 = vmul.f32 %v2069_v48, %v2777_v13  ;;  %v1209_v23 = vmul.f32 %v2069_v48, %v2775_v3 }
 0x2a3   : > { %2074 = vrcp.f32 %v1168_v49 }
 0x2a4   : > { %1341 = vmatprep.mubr.f32.mxu1 %v1210_v12  ;;  %1387 = vst [vmem:[%s2804_s17 + $0xc8] sm:$0xff] %v1210_v12  ;;  %1386 = vst [vmem:[%s2804_s17 + $0xc0] sm:$0xff] %v1209_v23 }
 0x2a5   : > { %v2071_v59 = vpop.eup %2070  ;;  %1342 = vmatmul.mubr.f32.gmra.mrb[24].mxu1 %v1209_v23 }
 0x2a6   : > { %v1212_v61 = vmul.f32 %v2071_v59, %v2783_v14  ;;  %v1211_v30 = vmul.f32 %v2071_v59, %v2781_v10 }
 0x2a8   : > { %1346 = vmatprep.mubr.f32.mxu1 %v1212_v61  ;;  %1389 = vst [vmem:[%s2804_s17 + $0xd8] sm:$0xff] %v1212_v61  ;;  %1388 = vst [vmem:[%s2804_s17 + $0xd0] sm:$0xff] %v1211_v30 }
 0x2a9   : > { %v2073_v13 = vpop.eup %2072  ;;  %1347 = vmatmul.mubr.f32.gmra.mrb[26].mxu1 %v1211_v30 }
 0x2aa   : > { %v1214_v3 = vmul.f32 %v2073_v13, %v2789_v9  ;;  %v1213_v40 = vmul.f32 %v2073_v13, %v2787_v18 }
 0x2ac   : > { %1351 = vmatprep.mubr.f32.mxu1 %v1214_v3  ;;  %1391 = vst [vmem:[%s2804_s17 + $0xe8] sm:$0xff] %v1214_v3  ;;  %1390 = vst [vmem:[%s2804_s17 + $0xe0] sm:$0xff] %v1213_v40 }
 0x2ad   : > { %v2075_v14 = vpop.eup %2074  ;;  %1352 = vmatmul.mubr.f32.gmra.mrb[28].mxu1 %v1213_v40 }
 0x2ae   : > { %v1216_v10 = vmul.f32 %v2075_v14, %v2795_v27  ;;  %v1215_v43 = vmul.f32 %v2075_v14, %v2793_v22 }
 0x2b0   : > { %1356 = vmatprep.mubr.f32.mxu1 %v1216_v10  ;;  %1393 = vst [vmem:[%s2804_s17 + $0xf8] sm:$0xff] %v1216_v10  ;;  %1392 = vst [vmem:[%s2804_s17 + $0xf0] sm:$0xff] %v1215_v43  ;;  %s2082_s17 = scalar_lea.vmem %s2081_s22, 8192 }
 0x2b1   : > { %1357 = vmatmul.mubr.f32.gmra.mrb[30].mxu1 %v1215_v43  ;;  %p2084_p6 = scmp.lt.s32.totalorder %s2082_s17, %s2076_s0 }
 0x2b3   : > { %p2085_p7 = por %p2084_p6, %p2083_p5 }
 0x2b5   : > { %p2086_p9 = pnand %p2085_p7, %p2079_p4 }
 0x2b7   : > { %2089 = shalt.err (!%p2086_p9)
}
 0x2b8   : > { %s2090_s13 = scalar_lea.hbm %s2874_s14, 4096  ;;  %s2094_s9 = scalar_lea.hbm %s2976_s5, 32768 }
 0x2b9   : > { %p2091_p10 = scmp.ne.s32.totalorder %s2874_s14, %s2090_s13  ;;  %p2095_p13 = scmp.lt.u32.totalorder %s2874_s14, %s2976_s5 }
 0x2ba   : > { %p2096_p0 = scmp.lt.u32.totalorder %s2094_s9, %s2090_s13  ;;  %p2098_p2 = scmp.lt.u32.totalorder %s2090_s13, %s2874_s14 }
 0x2bb   : > { %p2092_p11 = pnand %p2091_p10, %p2257_p3 }
 0x2bc   : > { %p2097_p1 = por %p2096_p0, %p2095_p13 }
 0x2bd   : > { %p2093_p12 = pneg %p2092_p11 }
 0x2be   : > { %p2099_p4 = por %p2098_p2, %p2097_p1 }
 0x2c0   : > { %p2100_p5 = pnand %p2099_p4, %p2093_p12 }
 0x2c2   : > { %2103 = shalt.err (!%p2100_p5)
}
 0x2c3   : > { %s2174_s0 = smov 256   ;;  %s2175_s16 = smov 16  }
 0x2c4   : > { %1906 = dma.vmem_to_hbm [thread:$0]  (%p2257_p3), %s2876_s12, 4096, %s2874_s14, %s2880_s30, %s2174_s0, %s2174_s0, %s2175_s16  }
 0x2c5   : > { %s3002_s21 = sshll.u32 %s2303_s27, 3 }
 0x2c6   : > { %s2909_s26 = scalar_lea.vmem %s2975_s4, %s3002_s21 }
 0x348   : > { %v1778_v18 = vpop.f32.mrb[0].mxu1 }
 0x349   : > { %v1779_v9 = vpop.f32.mrb[1].mxu1 }
 0x34a   : > { %v1780_v22 = vadd.f32 %v1779_v9, %v1778_v18 }
 0x34c   : > { %1394 = vst.msk [vmem:[%s2909_s26] sm:$0xff] %vm463_vm0, %v1780_v22  ;;  %v1781_v27 = vpop.f32.mrb[2].mxu1 }
 0x34d   : > { %v1782_v35 = vpop.f32.mrb[3].mxu1 }
 0x34e   : > { %v1783_v0 = vadd.f32 %v1782_v35, %v1781_v27 }
 0x350   : > { %1395 = vst.msk [vmem:[%s2909_s26 + $0x8] sm:$0xff] %vm463_vm0, %v1783_v0  ;;  %v1784_v34 = vpop.f32.mrb[4].mxu1 }
 0x351   : > { %v1785_v36 = vpop.f32.mrb[5].mxu1 }
 0x352   : > { %v1786_v37 = vadd.f32 %v1785_v36, %v1784_v34 }
 0x354   : > { %1396 = vst.msk [vmem:[%s2909_s26 + $0x10] sm:$0xff] %vm463_vm0, %v1786_v37  ;;  %v1787_v15 = vpop.f32.mrb[6].mxu1 }
 0x355   : > { %v1788_v44 = vpop.f32.mrb[7].mxu1 }
 0x356   : > { %v1789_v20 = vadd.f32 %v1788_v44, %v1787_v15 }
 0x358   : > { %1397 = vst.msk [vmem:[%s2909_s26 + $0x18] sm:$0xff] %vm463_vm0, %v1789_v20  ;;  %v1790_v54 = vpop.f32.mrb[8].mxu1 }
 0x359   : > { %v1791_v56 = vpop.f32.mrb[9].mxu1 }
 0x35a   : > { %v1792_v47 = vadd.f32 %v1791_v56, %v1790_v54 }
 0x35c   : > { %1398 = vst.msk [vmem:[%s2909_s26 + $0x20] sm:$0xff] %vm463_vm0, %v1792_v47  ;;  %v1793_v51 = vpop.f32.mrb[10].mxu1 }
 0x35d   : > { %v1794_v41 = vpop.f32.mrb[11].mxu1 }
 0x35e   : > { %v1795_v46 = vadd.f32 %v1794_v41, %v1793_v51 }
 0x360   : > { %1399 = vst.msk [vmem:[%s2909_s26 + $0x28] sm:$0xff] %vm463_vm0, %v1795_v46  ;;  %v1796_v28 = vpop.f32.mrb[12].mxu1 }
 0x361   : > { %v1797_v63 = vpop.f32.mrb[13].mxu1 }
 0x362   : > { %v1798_v60 = vadd.f32 %v1797_v63, %v1796_v28 }
 0x364   : > { %1400 = vst.msk [vmem:[%s2909_s26 + $0x30] sm:$0xff] %vm463_vm0, %v1798_v60  ;;  %v1799_v33 = vpop.f32.mrb[14].mxu1 }
 0x365   : > { %v1800_v45 = vpop.f32.mrb[15].mxu1 }
 0x366   : > { %v1801_v17 = vadd.f32 %v1800_v45, %v1799_v33 }
 0x368   : > { %1401 = vst.msk [vmem:[%s2909_s26 + $0x38] sm:$0xff] %vm463_vm0, %v1801_v17  ;;  %v1802_v16 = vpop.f32.mrb[16].mxu1 }
 0x369   : > { %v1803_v50 = vpop.f32.mrb[17].mxu1 }
 0x36a   : > { %v1804_v52 = vadd.f32 %v1803_v50, %v1802_v16 }
 0x36c   : > { %1402 = vst.msk [vmem:[%s2909_s26 + $0x40] sm:$0xff] %vm463_vm0, %v1804_v52  ;;  %v1805_v25 = vpop.f32.mrb[18].mxu1 }
 0x36d   : > { %v1806_v21 = vpop.f32.mrb[19].mxu1 }
 0x36e   : > { %v1807_v55 = vadd.f32 %v1806_v21, %v1805_v25 }
 0x370   : > { %1403 = vst.msk [vmem:[%s2909_s26 + $0x48] sm:$0xff] %vm463_vm0, %v1807_v55  ;;  %v1808_v53 = vpop.f32.mrb[20].mxu1 }
 0x371   : > { %v1809_v42 = vpop.f32.mrb[21].mxu1 }
 0x372   : > { %v1810_v38 = vadd.f32 %v1809_v42, %v1808_v53 }
 0x374   : > { %1404 = vst.msk [vmem:[%s2909_s26 + $0x50] sm:$0xff] %vm463_vm0, %v1810_v38  ;;  %v1811_v57 = vpop.f32.mrb[22].mxu1 }
 0x375   : > { %v1812_v8 = vpop.f32.mrb[23].mxu1 }
 0x376   : > { %v1813_v6 = vadd.f32 %v1812_v8, %v1811_v57 }
 0x378   : > { %1405 = vst.msk [vmem:[%s2909_s26 + $0x58] sm:$0xff] %vm463_vm0, %v1813_v6  ;;  %v1814_v58 = vpop.f32.mrb[24].mxu1 }
 0x379   : > { %v1815_v62 = vpop.f32.mrb[25].mxu1 }
 0x37a   : > { %v1816_v1 = vadd.f32 %v1815_v62, %v1814_v58 }
 0x37c   : > { %1406 = vst.msk [vmem:[%s2909_s26 + $0x60] sm:$0xff] %vm463_vm0, %v1816_v1  ;;  %v1817_v24 = vpop.f32.mrb[26].mxu1 }
 0x37d   : > { %v1818_v26 = vpop.f32.mrb[27].mxu1 }
 0x37e   : > { %v1819_v2 = vadd.f32 %v1818_v26, %v1817_v24 }
 0x380   : > { %1407 = vst.msk [vmem:[%s2909_s26 + $0x68] sm:$0xff] %vm463_vm0, %v1819_v2  ;;  %v1820_v19 = vpop.f32.mrb[28].mxu1 }
 0x381   : > { %v1821_v32 = vpop.f32.mrb[29].mxu1 }
 0x382   : > { %v1822_v31 = vadd.f32 %v1821_v32, %v1820_v19 }
 0x384   : > { %1408 = vst.msk [vmem:[%s2909_s26 + $0x70] sm:$0xff] %vm463_vm0, %v1822_v31  ;;  %v1823_v4 = vpop.f32.mrb[30].mxu1 }
 0x385   : > { %v1824_v7 = vpop.f32.mrb[31].mxu1 }
 0x386   : > { %v1825_v39 = vadd.f32 %v1824_v7, %v1823_v4 }
 0x388   : > { %1409 = vst.msk [vmem:[%s2909_s26 + $0x78] sm:$0xff] %vm463_vm0, %v1825_v39 }
 0x389 PF: > { %p1912_p3 = scmp.ge.s32.totalorder %s2170_s25, 2  ;;  %s1467_s6 = sand.u32 1, %s2142_s18  }
 0x38a   : > { %s1468_s27 = scalar_lea.sflag [#allocation3], %s1467_s6 }
 0x38b   : > { %p1909_p6 = pnand %p1912_p3, %p2266_p8 }
 0x38d   : > { %2137 = dma.done.wait (!%p1909_p6), %s1468_s27, 4096  }
 0x38e   : > { %2139 = vsyncadd (!%p1909_p6), %s1468_s27, 4294963200  ;;  %s19_s25 = sadd.s32 1, %s2170_s25   ;;  %s3003_s18 = smov %s2146_s19 }
 0x38f   : > { %p16_p7 = scmp.ge.s32.totalorder %s19_s25, 10   ;;  %s3004_s19 = smov %s2150_s20 }
 0x390   : > { %s3005_s20 = smov %s2275_s11  ;;  %s3006_s21 = smov %s2162_s23 }
 0x391   : > { %s3007_s22 = smov %s2166_s24  ;;  %s3008_s23 = smov %s3011_s28 }
 0x392   : > { %s3009_s24 = smov %s3015_s29  ;;  %18 = sbr.rel (!%p16_p7) target bundleno = 7 (0x7), region = 92 }
 0x399   :  { %1473 = vsyncpa [#allocation3], 1 }
 0x39a   :  { %1475 = vsyncpa [#allocation3 + $0x1], 1 }

</bundles_post_ra>
